<compile_context>
chip_gen: v7x
topology: tpu7x:2x2x1
jax: 0.10.0
libtpu: 0.0.40
codegen_flags: <defaults>
</compile_context>

<pallas_src>
import functools

import jax
import jax.numpy as jnp
from jax.experimental import pallas as pl
from jax.experimental.pallas import tpu as pltpu

LANE = 128                     # lane width for channel / K padding
TM_MATMUL = 1024               # max row tile for conv matmul
TK_MATMUL = 1024               # max contraction tile for conv matmul
VMEM_LIMIT = 32 * 1024 * 1024  # safe on v5e/v6e/v7x; per-step tiles stay ~10 MiB


def _round_up(x, m):
    return (x + m - 1) // m * m


# ----------------------------- Pallas kernel -----------------------------

def _conv_matmul_kernel(a_ref, w_ref, b_ref, *rest, negative_slope, emit_stats):
    # a_ref: (tm, tk) bf16 im2col rows, w_ref: (tk, Np) bf16, b_ref: (1, Np) f32
    # outputs: o_ref (tm, Np) out_dtype [, stats_ref (8, Np) f32: row0=sum, row1=sumsq]
    # scratch: acc_ref (tm, Np) f32 (kept because o_ref is bf16)
    if emit_stats:
        o_ref, stats_ref, acc_ref = rest
    else:
        o_ref, acc_ref = rest
        stats_ref = None

    k = pl.program_id(1)

    @pl.when(k == 0)
    def _():
        acc_ref[...] = jnp.zeros_like(acc_ref)

    acc_ref[...] += jnp.dot(a_ref[...], w_ref[...], preferred_element_type=jnp.float32)

    @pl.when(k == pl.num_programs(1) - 1)
    def _():
        acc = acc_ref[...] + b_ref[...]
        if negative_slope is not None:
            acc = jnp.where(acc > 0, acc, negative_slope * acc)
        o_ref[...] = acc.astype(o_ref.dtype)
        if emit_stats:
            # Pre-activation stats in f32. Only two sublane rows are written; the
            # remaining rows of the (8, Np) block are never read on the host side.
            stats_ref[0:1, :] = jnp.sum(acc, axis=0, keepdims=True)
            stats_ref[1:2, :] = jnp.sum(acc * acc, axis=0, keepdims=True)


# ----------------------------- layer wrapper -----------------------------

def conv2d_pallas(x, w, bias, *, stride, negative_slope=None, emit_stats=False,
                  in_scale=None, in_shift=None, in_negative_slope=None,
                  out_dtype=jnp.bfloat16):
    """4x4/pad-1 conv. x: (N,H,W,Cin), w: (Cout,Cin,4,4) (PyTorch layout).

    Optional fused input transform (previous layer's BatchNorm + LeakyReLU):
      x <- leaky(x * in_scale + in_shift)   applied BEFORE spatial zero padding.
    Returns y (N,OH,OW,Cout) in out_dtype; if emit_stats also (sum_c, sumsq_c, count)
    for the following BatchNorm2d's batch statistics (pre-activation, f32 accumulator).
    """
    N, H, W, Cin = x.shape
    Cout, _, KH, KW = w.shape
    pad = 1
    OH = (H + 2 * pad - KH) // stride + 1
    OW = (W + 2 * pad - KW) // stride + 1

    if emit_stats:
        # Stats are defined pre-activation and rely on zero bias so zero-padded rows
        # of the im2col matrix contribute nothing to the sums.
        assert negative_slope is None, "BN stats must be pre-activation"
        assert bias is None, "BN-normalized convs have no bias (use_bias=False)"

    # Fold the previous layer's BatchNorm scale/shift + LeakyReLU(0.2) into this
    # conv's input path (pre-padding), instead of a standalone elementwise pass.
    if in_scale is not None:
        xf = x.astype(jnp.float32) * in_scale + in_shift
        if in_negative_slope is not None:
            xf = jnp.where(xf > 0, xf, in_negative_slope * xf)
        x = xf
    xb = x.astype(jnp.bfloat16)

    # Pad Cin to a multiple of 8 so K = Cin_p * 16 is automatically a multiple of 128
    # (avoids an extra full-copy K-pad of the (M, K) im2col matrix).
    Cin_p = _round_up(Cin, 8)
    if Cin_p != Cin:
        xb = jnp.pad(xb, ((0, 0), (0, 0), (0, 0), (0, Cin_p - Cin)))
        w = jnp.pad(w, ((0, 0), (0, Cin_p - Cin), (0, 0), (0, 0)))

    # im2col in bf16 (JAX glue): patch flatten order (cin, kh, kw) matches
    # w.reshape(Cout, Cin_p*KH*KW).
    xp = jnp.pad(xb, ((0, 0), (pad, pad), (pad, pad), (0, 0)))
    cols = []
    for kh in range(KH):
        for kw in range(KW):
            cols.append(xp[:, kh:kh + stride * OH:stride, kw:kw + stride * OW:stride, :])
    patches = jnp.stack(cols, axis=-1)                          # (N,OH,OW,Cin_p,16)
    A = patches.reshape(N * OH * OW, Cin_p * KH * KW)           # bf16, K % 128 == 0
    Wmat = w.reshape(Cout, Cin_p * KH * KW).T.astype(jnp.bfloat16)

    M, K = A.shape
    tm = min(TM_MATMUL, _round_up(M, 16))      # 16: bf16 sublane packing
    Mp = _round_up(M, tm)
    tk = min(TK_MATMUL, K)                     # K is a multiple of 128 already
    Kp = _round_up(K, tk)
    Np = _round_up(Cout, LANE)

    A_p = jnp.pad(A, ((0, Mp - M), (0, Kp - K)))
    W_p = jnp.pad(Wmat, ((0, Kp - K), (0, Np - Cout)))
    b = jnp.zeros((Cout,), jnp.float32) if bias is None else bias.astype(jnp.float32)
    b_p = jnp.pad(b.reshape(1, Cout), ((0, 0), (0, Np - Cout)))

    grid_m, grid_k = Mp // tm, Kp // tk

    out_shapes = [jax.ShapeDtypeStruct((Mp, Np), out_dtype)]
    out_specs = [pl.BlockSpec((tm, Np), lambda i, k: (i, 0))]
    if emit_stats:
        out_shapes.append(jax.ShapeDtypeStruct((grid_m * 8, Np), jnp.float32))
        out_specs.append(pl.BlockSpec((8, Np), lambda i, k: (i, 0)))

    outs = pl.pallas_call(
        functools.partial(_conv_matmul_kernel,
                          negative_slope=negative_slope, emit_stats=emit_stats),
        out_shape=tuple(out_shapes),
        grid=(grid_m, grid_k),
        in_specs=[
            pl.BlockSpec((tm, tk), lambda i, k: (i, k)),
            pl.BlockSpec((tk, Np), lambda i, k: (k, 0)),
            pl.BlockSpec((1, Np), lambda i, k: (0, 0)),
        ],
        out_specs=tuple(out_specs),
        scratch_shapes=[pltpu.VMEM((tm, Np), jnp.float32)],
        compiler_params=pltpu.CompilerParams(
            dimension_semantics=("parallel", "arbitrary"),
            vmem_limit_bytes=VMEM_LIMIT),
    )(A_p, W_p, b_p)

    y = outs[0][:M, :Cout].reshape(N, OH, OW, Cout)
    if not emit_stats:
        return y
    st = outs[1].reshape(grid_m, 8, Np)
    ch_sum = jnp.sum(st[:, 0, :Cout], axis=0)
    ch_sumsq = jnp.sum(st[:, 1, :Cout], axis=0)
    return y, ch_sum, ch_sumsq, float(M)


def bn_scale_shift(gamma, beta, ch_sum, ch_sumsq, count, *, eps=1e-5):
    """BatchNorm2d training-mode batch stats (biased variance) -> per-channel
    scale/shift, to be fused into the next conv's input path. Tiny per-channel math,
    stays in plain JAX."""
    mean = ch_sum / count
    # TODO(synk): E[x^2]-E[x]^2 can cancel in f32 when |mean| >> std; use a shifted
    # sumsq if activations grow large. clamp keeps var >= 0.
    var = jnp.maximum(ch_sumsq / count - mean * mean, 0.0)
    scale = gamma * jax.lax.rsqrt(var + eps)
    shift = beta - mean * scale
    return scale, shift


# ----------------------------- model -----------------------------

def init_params(key, input_nc, ndf=64, n_layers=3):
    """Deterministic synthetic init (normal(0, 0.02) conv weights, BN gamma=1/beta=0).
    norm_layer == BatchNorm2d  =>  use_bias = False for the intermediate convs."""
    kw = 4

    def conv_w(k, cin, cout):
        return jax.random.normal(k, (cout, cin, kw, kw), jnp.float32) * 0.02

    keys = jax.random.split(key, n_layers + 2)
    layers = []
    # conv(input_nc, ndf, s=2) + LeakyReLU
    layers.append(dict(w=conv_w(keys[0], input_nc, ndf),
                       b=jnp.zeros((ndf,), jnp.float32),
                       stride=2, norm=False, act=True))
    nf_mult = 1
    for n in range(1, n_layers):
        nf_prev, nf_mult = nf_mult, min(2 ** n, 8)
        layers.append(dict(w=conv_w(keys[n], ndf * nf_prev, ndf * nf_mult),
                           b=None, stride=2, norm=True, act=True,
                           gamma=jnp.ones((ndf * nf_mult,), jnp.float32),
                           beta=jnp.zeros((ndf * nf_mult,), jnp.float32)))
    nf_prev, nf_mult = nf_mult, min(2 ** n_layers, 8)
    layers.append(dict(w=conv_w(keys[n_layers], ndf * nf_prev, ndf * nf_mult),
                       b=None, stride=1, norm=True, act=True,
                       gamma=jnp.ones((ndf * nf_mult,), jnp.float32),
                       beta=jnp.zeros((ndf * nf_mult,), jnp.float32)))
    # final conv(ndf*nf_mult, 1, s=1) with bias, no activation
    layers.append(dict(w=conv_w(keys[n_layers + 1], ndf * nf_mult, 1),
                       b=jnp.zeros((1,), jnp.float32),
                       stride=1, norm=False, act=False))
    return layers


def nlayer_discriminator_forward(x_nchw, layers):
    x = jnp.transpose(x_nchw, (0, 2, 3, 1)).astype(jnp.float32)   # NCHW -> NHWC
    pending = None   # (scale, shift) of a BatchNorm+LeakyReLU to fuse into next conv
    for idx, layer in enumerate(layers):
        is_last = idx == len(layers) - 1
        if pending is not None:
            in_scale, in_shift, in_ns = pending[0], pending[1], 0.2
            pending = None
        else:
            in_scale = in_shift = in_ns = None

        if layer["norm"]:
            y, s1, s2, cnt = conv2d_pallas(
                x, layer["w"], None, stride=layer["stride"],
                negative_slope=None, emit_stats=True,
                in_scale=in_scale, in_shift=in_shift, in_negative_slope=in_ns,
                out_dtype=jnp.bfloat16)
            pending = bn_scale_shift(layer["gamma"], layer["beta"], s1, s2, cnt)
            x = y
        else:
            ns = 0.2 if layer["act"] else None
            x = conv2d_pallas(
                x, layer["w"], layer["b"], stride=layer["stride"],
                negative_slope=ns, emit_stats=False,
                in_scale=in_scale, in_shift=in_shift, in_negative_slope=in_ns,
                out_dtype=jnp.float32 if is_last else jnp.bfloat16)
    return jnp.transpose(x, (0, 3, 1, 2))                          # NHWC -> NCHW


if __name__ == "__main__":
    key = jax.random.PRNGKey(0)
    k_x, k_p = jax.random.split(key)

    # small but valid shapes: 4x4/stride-2 convs need enough spatial extent
    N, input_nc, Hs, Ws = 2, 3, 32, 32
    ndf, n_layers = 16, 3

    x = jax.random.normal(k_x, (N, input_nc, Hs, Ws), jnp.float32)
    layers = init_params(k_p, input_nc, ndf=ndf, n_layers=n_layers)

    y = jax.jit(lambda inp: nlayer_discriminator_forward(inp, layers))(x)
    jax.block_until_ready(y)

    # 32 -> 16 -> 8 -> 4 -> 3 -> 2 spatial; 1 output channel (PatchGAN logits map)
    assert y.shape == (N, 1, 2, 2), y.shape
    assert bool(jnp.all(jnp.isfinite(y)))
    print("KERNEL_OK")
</pallas_src>

<mosaic_0001>
module attributes {stable_mosaic.version = 11 : i64} {
  func.func @_conv_matmul_kernel(%arg0: i32, %arg1: i32, %arg2: memref<512x128xbf16, #tpu.memory_space<vmem>>, %arg3: memref<128x128xbf16, #tpu.memory_space<vmem>>, %arg4: memref<1x128xf32, #tpu.memory_space<vmem>>, %arg5: memref<512x128xbf16, #tpu.memory_space<vmem>>, %arg6: memref<512x128xf32, #tpu.memory_space<vmem>>) attributes {dimension_semantics = [#tpu.dimension_semantics<parallel>, #tpu.dimension_semantics<arbitrary>], iteration_bounds = array<i64: 1, 1>, scalar_prefetch = 0 : i64, scratch_operands = 1 : i64, tpu.core_type = #tpu.core_type<tc>, window_params = [{transform_indices = @transform_0, window_bounds = array<i64: 512, 128>}, {transform_indices = @transform_1, window_bounds = array<i64: 128, 128>}, {pipeline_mode = #tpu.pipeline_mode<synchronous>, transform_indices = @transform_2, window_bounds = array<i64: 1, 128>}, {transform_indices = @transform_3, window_bounds = array<i64: 512, 128>}]} {
    %c0_i32 = arith.constant 0 : i32
    %0 = arith.cmpi eq, %arg1, %c0_i32 : i32
    %1 = arith.extui %0 : i1 to i32
    %c0_i32_0 = arith.constant 0 : i32
    %2 = arith.cmpi ne, %1, %c0_i32_0 : i32
    scf.if %2 {
      %cst_10 = arith.constant 0.000000e+00 : f32
      %12 = vector.broadcast %cst_10 : f32 to vector<512x128xf32>
      %c0_11 = arith.constant 0 : index
      %c0_12 = arith.constant 0 : index
      %13 = vector.load %arg6[%c0_11, %c0_12] : memref<512x128xf32, #tpu.memory_space<vmem>>, vector<512x128xf32>
      tpu.vector_store %arg6[%c0_11, %c0_12], %12 {strides = array<i32>} : memref<512x128xf32, #tpu.memory_space<vmem>>, vector<512x128xf32>,
    } else {
    }
    %c0 = arith.constant 0 : index
    %c0_1 = arith.constant 0 : index
    %3 = vector.load %arg6[%c0, %c0_1] : memref<512x128xf32, #tpu.memory_space<vmem>>, vector<512x128xf32>
    %c0_2 = arith.constant 0 : index
    %c0_3 = arith.constant 0 : index
    %4 = vector.load %arg2[%c0_2, %c0_3] : memref<512x128xbf16, #tpu.memory_space<vmem>>, vector<512x128xbf16>
    %c0_4 = arith.constant 0 : index
    %c0_5 = arith.constant 0 : index
    %5 = vector.load %arg3[%c0_4, %c0_5] : memref<128x128xbf16, #tpu.memory_space<vmem>>, vector<128x128xbf16>
    %cst = arith.constant dense<0.000000e+00> : vector<512x128xf32>
    %6 = tpu.matmul %4, %5, %cst {dimension_numbers = #tpu.dot_dimension_numbers<[1], [0], [0], [1], [0, 0, 1, 1], [], []>} : vector<512x128xbf16>, vector<128x128xbf16>, vector<512x128xf32> -> vector<512x128xf32>
    %7 = arith.addf %3, %6 : vector<512x128xf32>
    %c0_6 = arith.constant 0 : index
    %c0_7 = arith.constant 0 : index
    %8 = vector.load %arg6[%c0_6, %c0_7] : memref<512x128xf32, #tpu.memory_space<vmem>>, vector<512x128xf32>
    tpu.vector_store %arg6[%c0_6, %c0_7], %7 {strides = array<i32>} : memref<512x128xf32, #tpu.memory_space<vmem>>, vector<512x128xf32>,
    %c0_i32_8 = arith.constant 0 : i32
    %9 = arith.cmpi eq, %arg1, %c0_i32_8 : i32
    %10 = arith.extui %9 : i1 to i32
    %c0_i32_9 = arith.constant 0 : i32
    %11 = arith.cmpi ne, %10, %c0_i32_9 : i32
    scf.if %11 {
      %c0_10 = arith.constant 0 : index
      %c0_11 = arith.constant 0 : index
      %12 = vector.load %arg6[%c0_10, %c0_11] : memref<512x128xf32, #tpu.memory_space<vmem>>, vector<512x128xf32>
      %c0_12 = arith.constant 0 : index
      %c0_13 = arith.constant 0 : index
      %13 = vector.load %arg4[%c0_12, %c0_13] : memref<1x128xf32, #tpu.memory_space<vmem>>, vector<1x128xf32>
      %14 = vector.broadcast %13 : vector<1x128xf32> to vector<512x128xf32>
      %15 = arith.addf %12, %14 : vector<512x128xf32>
      %cst_14 = arith.constant 0.000000e+00 : f32
      %16 = vector.broadcast %cst_14 : f32 to vector<512x128xf32>
      %17 = arith.cmpf ogt, %15, %16 : vector<512x128xf32>
      %cst_15 = arith.constant 2.000000e-01 : f32
      %18 = vector.broadcast %cst_15 : f32 to vector<512x128xf32>
      %19 = arith.mulf %18, %15 : vector<512x128xf32>
      %20 = arith.select %17, %15, %19 : vector<512x128xi1>, vector<512x128xf32>
      %21 = arith.truncf %20 : vector<512x128xf32> to vector<512x128xbf16>
      %c0_16 = arith.constant 0 : index
      %c0_17 = arith.constant 0 : index
      %22 = vector.load %arg5[%c0_16, %c0_17] : memref<512x128xbf16, #tpu.memory_space<vmem>>, vector<512x128xbf16>
      tpu.vector_store %arg5[%c0_16, %c0_17], %21 {strides = array<i32>} : memref<512x128xbf16, #tpu.memory_space<vmem>>, vector<512x128xbf16>,
    } else {
    }
    return
  }
  func.func @transform_0(%arg0: i32, %arg1: i32) -> (i32, i32) {
    %c0_i32 = arith.constant 0 : i32
    return %arg0, %arg1 : i32, i32
  }
  func.func @transform_1(%arg0: i32, %arg1: i32) -> (i32, i32) {
    %c0_i32 = arith.constant 0 : i32
    %c0_i32_0 = arith.constant 0 : i32
    return %arg1, %c0_i32 : i32, i32
  }
  func.func @transform_2(%arg0: i32, %arg1: i32) -> (i32, i32) {
    %c0_i32 = arith.constant 0 : i32
    %c0_i32_0 = arith.constant 0 : i32
    %c0_i32_1 = arith.constant 0 : i32
    return %c0_i32, %c0_i32_0 : i32, i32
  }
  func.func @transform_3(%arg0: i32, %arg1: i32) -> (i32, i32) {
    %c0_i32 = arith.constant 0 : i32
    %c0_i32_0 = arith.constant 0 : i32
    return %arg0, %c0_i32 : i32, i32
  }
}

module attributes {stable_mosaic.version = 11 : i64} {
  func.func @_conv_matmul_kernel(%arg0: i32, %arg1: i32, %arg2: memref<128x256xbf16, #tpu.memory_space<vmem>>, %arg3: memref<256x128xbf16, #tpu.memory_space<vmem>>, %arg4: memref<1x128xf32, #tpu.memory_space<vmem>>, %arg5: memref<128x128xbf16, #tpu.memory_space<vmem>>, %arg6: memref<8x128xf32, #tpu.memory_space<vmem>>, %arg7: memref<128x128xf32, #tpu.memory_space<vmem>>) attributes {dimension_semantics = [#tpu.dimension_semantics<parallel>, #tpu.dimension_semantics<arbitrary>], iteration_bounds = array<i64: 1, 1>, scalar_prefetch = 0 : i64, scratch_operands = 1 : i64, tpu.core_type = #tpu.core_type<tc>, window_params = [{transform_indices = @transform_0, window_bounds = array<i64: 128, 256>}, {transform_indices = @transform_1, window_bounds = array<i64: 256, 128>}, {pipeline_mode = #tpu.pipeline_mode<synchronous>, transform_indices = @transform_2, window_bounds = array<i64: 1, 128>}, {transform_indices = @transform_3, window_bounds = array<i64: 128, 128>}, {transform_indices = @transform_4, window_bounds = array<i64: 8, 128>}]} {
    %c0_i32 = arith.constant 0 : i32
    %0 = arith.cmpi eq, %arg1, %c0_i32 : i32
    %1 = arith.extui %0 : i1 to i32
    %c0_i32_0 = arith.constant 0 : i32
    %2 = arith.cmpi ne, %1, %c0_i32_0 : i32
    scf.if %2 {
      %cst_10 = arith.constant 0.000000e+00 : f32
      %12 = vector.broadcast %cst_10 : f32 to vector<128x128xf32>
      %c0_11 = arith.constant 0 : index
      %c0_12 = arith.constant 0 : index
      %13 = vector.load %arg7[%c0_11, %c0_12] : memref<128x128xf32, #tpu.memory_space<vmem>>, vector<128x128xf32>
      tpu.vector_store %arg7[%c0_11, %c0_12], %12 {strides = array<i32>} : memref<128x128xf32, #tpu.memory_space<vmem>>, vector<128x128xf32>,
    } else {
    }
    %c0 = arith.constant 0 : index
    %c0_1 = arith.constant 0 : index
    %3 = vector.load %arg7[%c0, %c0_1] : memref<128x128xf32, #tpu.memory_space<vmem>>, vector<128x128xf32>
    %c0_2 = arith.constant 0 : index
    %c0_3 = arith.constant 0 : index
    %4 = vector.load %arg2[%c0_2, %c0_3] : memref<128x256xbf16, #tpu.memory_space<vmem>>, vector<128x256xbf16>
    %c0_4 = arith.constant 0 : index
    %c0_5 = arith.constant 0 : index
    %5 = vector.load %arg3[%c0_4, %c0_5] : memref<256x128xbf16, #tpu.memory_space<vmem>>, vector<256x128xbf16>
    %cst = arith.constant dense<0.000000e+00> : vector<128x128xf32>
    %6 = tpu.matmul %4, %5, %cst {dimension_numbers = #tpu.dot_dimension_numbers<[1], [0], [0], [1], [0, 0, 1, 1], [], []>} : vector<128x256xbf16>, vector<256x128xbf16>, vector<128x128xf32> -> vector<128x128xf32>
    %7 = arith.addf %3, %6 : vector<128x128xf32>
    %c0_6 = arith.constant 0 : index
    %c0_7 = arith.constant 0 : index
    %8 = vector.load %arg7[%c0_6, %c0_7] : memref<128x128xf32, #tpu.memory_space<vmem>>, vector<128x128xf32>
    tpu.vector_store %arg7[%c0_6, %c0_7], %7 {strides = array<i32>} : memref<128x128xf32, #tpu.memory_space<vmem>>, vector<128x128xf32>,
    %c0_i32_8 = arith.constant 0 : i32
    %9 = arith.cmpi eq, %arg1, %c0_i32_8 : i32
    %10 = arith.extui %9 : i1 to i32
    %c0_i32_9 = arith.constant 0 : i32
    %11 = arith.cmpi ne, %10, %c0_i32_9 : i32
    scf.if %11 {
      %c0_10 = arith.constant 0 : index
      %c0_11 = arith.constant 0 : index
      %12 = vector.load %arg7[%c0_10, %c0_11] : memref<128x128xf32, #tpu.memory_space<vmem>>, vector<128x128xf32>
      %c0_12 = arith.constant 0 : index
      %c0_13 = arith.constant 0 : index
      %13 = vector.load %arg4[%c0_12, %c0_13] : memref<1x128xf32, #tpu.memory_space<vmem>>, vector<1x128xf32>
      %14 = vector.broadcast %13 : vector<1x128xf32> to vector<128x128xf32>
      %15 = arith.addf %12, %14 : vector<128x128xf32>
      %16 = arith.truncf %15 : vector<128x128xf32> to vector<128x128xbf16>
      %c0_14 = arith.constant 0 : index
      %c0_15 = arith.constant 0 : index
      %17 = vector.load %arg5[%c0_14, %c0_15] : memref<128x128xbf16, #tpu.memory_space<vmem>>, vector<128x128xbf16>
      tpu.vector_store %arg5[%c0_14, %c0_15], %16 {strides = array<i32>} : memref<128x128xbf16, #tpu.memory_space<vmem>>, vector<128x128xbf16>,
      %cst_16 = arith.constant dense<0.000000e+00> : vector<128xf32>
      %18 = vector.multi_reduction <add>, %15, %cst_16 [0] : vector<128x128xf32> to vector<128xf32>
      %19 = vector.shape_cast %18 : vector<128xf32> to vector<1x128xf32>
      %c0_17 = arith.constant 0 : index
      %c0_18 = arith.constant 0 : index
      %20 = vector.load %arg6[%c0_17, %c0_18] : memref<8x128xf32, #tpu.memory_space<vmem>>, vector<1x128xf32>
      tpu.vector_store %arg6[%c0_17, %c0_18], %19 {strides = array<i32>} : memref<8x128xf32, #tpu.memory_space<vmem>>, vector<1x128xf32>,
      %21 = arith.mulf %15, %15 : vector<128x128xf32>
      %cst_19 = arith.constant dense<0.000000e+00> : vector<128xf32>
      %22 = vector.multi_reduction <add>, %21, %cst_19 [0] : vector<128x128xf32> to vector<128xf32>
      %23 = vector.shape_cast %22 : vector<128xf32> to vector<1x128xf32>
      %c1 = arith.constant 1 : index
      %c0_20 = arith.constant 0 : index
      %24 = vector.load %arg6[%c1, %c0_20] : memref<8x128xf32, #tpu.memory_space<vmem>>, vector<1x128xf32>
      tpu.vector_store %arg6[%c1, %c0_20], %23 {strides = array<i32>} : memref<8x128xf32, #tpu.memory_space<vmem>>, vector<1x128xf32>,
    } else {
    }
    return
  }
  func.func @transform_0(%arg0: i32, %arg1: i32) -> (i32, i32) {
    %c0_i32 = arith.constant 0 : i32
    return %arg0, %arg1 : i32, i32
  }
  func.func @transform_1(%arg0: i32, %arg1: i32) -> (i32, i32) {
    %c0_i32 = arith.constant 0 : i32
    %c0_i32_0 = arith.constant 0 : i32
    return %arg1, %c0_i32 : i32, i32
  }
  func.func @transform_2(%arg0: i32, %arg1: i32) -> (i32, i32) {
    %c0_i32 = arith.constant 0 : i32
    %c0_i32_0 = arith.constant 0 : i32
    %c0_i32_1 = arith.constant 0 : i32
    return %c0_i32, %c0_i32_0 : i32, i32
  }
  func.func @transform_3(%arg0: i32, %arg1: i32) -> (i32, i32) {
    %c0_i32 = arith.constant 0 : i32
    %c0_i32_0 = arith.constant 0 : i32
    return %arg0, %c0_i32 : i32, i32
  }
  func.func @transform_4(%arg0: i32, %arg1: i32) -> (i32, i32) {
    %c0_i32 = arith.constant 0 : i32
    %c0_i32_0 = arith.constant 0 : i32
    return %arg0, %c0_i32 : i32, i32
  }
}

module attributes {stable_mosaic.version = 11 : i64} {
  func.func @_conv_matmul_kernel(%arg0: i32, %arg1: i32, %arg2: memref<32x512xbf16, #tpu.memory_space<vmem>>, %arg3: memref<512x128xbf16, #tpu.memory_space<vmem>>, %arg4: memref<1x128xf32, #tpu.memory_space<vmem>>, %arg5: memref<32x128xbf16, #tpu.memory_space<vmem>>, %arg6: memref<8x128xf32, #tpu.memory_space<vmem>>, %arg7: memref<32x128xf32, #tpu.memory_space<vmem>>) attributes {dimension_semantics = [#tpu.dimension_semantics<parallel>, #tpu.dimension_semantics<arbitrary>], iteration_bounds = array<i64: 1, 1>, scalar_prefetch = 0 : i64, scratch_operands = 1 : i64, tpu.core_type = #tpu.core_type<tc>, window_params = [{transform_indices = @transform_0, window_bounds = array<i64: 32, 512>}, {transform_indices = @transform_1, window_bounds = array<i64: 512, 128>}, {pipeline_mode = #tpu.pipeline_mode<synchronous>, transform_indices = @transform_2, window_bounds = array<i64: 1, 128>}, {transform_indices = @transform_3, window_bounds = array<i64: 32, 128>}, {transform_indices = @transform_4, window_bounds = array<i64: 8, 128>}]} {
    %c0_i32 = arith.constant 0 : i32
    %0 = arith.cmpi eq, %arg1, %c0_i32 : i32
    %1 = arith.extui %0 : i1 to i32
    %c0_i32_0 = arith.constant 0 : i32
    %2 = arith.cmpi ne, %1, %c0_i32_0 : i32
    scf.if %2 {
      %cst_10 = arith.constant 0.000000e+00 : f32
      %12 = vector.broadcast %cst_10 : f32 to vector<32x128xf32>
      %c0_11 = arith.constant 0 : index
      %c0_12 = arith.constant 0 : index
      %13 = vector.load %arg7[%c0_11, %c0_12] : memref<32x128xf32, #tpu.memory_space<vmem>>, vector<32x128xf32>
      tpu.vector_store %arg7[%c0_11, %c0_12], %12 {strides = array<i32>} : memref<32x128xf32, #tpu.memory_space<vmem>>, vector<32x128xf32>,
    } else {
    }
    %c0 = arith.constant 0 : index
    %c0_1 = arith.constant 0 : index
    %3 = vector.load %arg7[%c0, %c0_1] : memref<32x128xf32, #tpu.memory_space<vmem>>, vector<32x128xf32>
    %c0_2 = arith.constant 0 : index
    %c0_3 = arith.constant 0 : index
    %4 = vector.load %arg2[%c0_2, %c0_3] : memref<32x512xbf16, #tpu.memory_space<vmem>>, vector<32x512xbf16>
    %c0_4 = arith.constant 0 : index
    %c0_5 = arith.constant 0 : index
    %5 = vector.load %arg3[%c0_4, %c0_5] : memref<512x128xbf16, #tpu.memory_space<vmem>>, vector<512x128xbf16>
    %cst = arith.constant dense<0.000000e+00> : vector<32x128xf32>
    %6 = tpu.matmul %4, %5, %cst {dimension_numbers = #tpu.dot_dimension_numbers<[1], [0], [0], [1], [0, 0, 1, 1], [], []>} : vector<32x512xbf16>, vector<512x128xbf16>, vector<32x128xf32> -> vector<32x128xf32>
    %7 = arith.addf %3, %6 : vector<32x128xf32>
    %c0_6 = arith.constant 0 : index
    %c0_7 = arith.constant 0 : index
    %8 = vector.load %arg7[%c0_6, %c0_7] : memref<32x128xf32, #tpu.memory_space<vmem>>, vector<32x128xf32>
    tpu.vector_store %arg7[%c0_6, %c0_7], %7 {strides = array<i32>} : memref<32x128xf32, #tpu.memory_space<vmem>>, vector<32x128xf32>,
    %c0_i32_8 = arith.constant 0 : i32
    %9 = arith.cmpi eq, %arg1, %c0_i32_8 : i32
    %10 = arith.extui %9 : i1 to i32
    %c0_i32_9 = arith.constant 0 : i32
    %11 = arith.cmpi ne, %10, %c0_i32_9 : i32
    scf.if %11 {
      %c0_10 = arith.constant 0 : index
      %c0_11 = arith.constant 0 : index
      %12 = vector.load %arg7[%c0_10, %c0_11] : memref<32x128xf32, #tpu.memory_space<vmem>>, vector<32x128xf32>
      %c0_12 = arith.constant 0 : index
      %c0_13 = arith.constant 0 : index
      %13 = vector.load %arg4[%c0_12, %c0_13] : memref<1x128xf32, #tpu.memory_space<vmem>>, vector<1x128xf32>
      %14 = vector.broadcast %13 : vector<1x128xf32> to vector<32x128xf32>
      %15 = arith.addf %12, %14 : vector<32x128xf32>
      %16 = arith.truncf %15 : vector<32x128xf32> to vector<32x128xbf16>
      %c0_14 = arith.constant 0 : index
      %c0_15 = arith.constant 0 : index
      %17 = vector.load %arg5[%c0_14, %c0_15] : memref<32x128xbf16, #tpu.memory_space<vmem>>, vector<32x128xbf16>
      tpu.vector_store %arg5[%c0_14, %c0_15], %16 {strides = array<i32>} : memref<32x128xbf16, #tpu.memory_space<vmem>>, vector<32x128xbf16>,
      %cst_16 = arith.constant dense<0.000000e+00> : vector<128xf32>
      %18 = vector.multi_reduction <add>, %15, %cst_16 [0] : vector<32x128xf32> to vector<128xf32>
      %19 = vector.shape_cast %18 : vector<128xf32> to vector<1x128xf32>
      %c0_17 = arith.constant 0 : index
      %c0_18 = arith.constant 0 : index
      %20 = vector.load %arg6[%c0_17, %c0_18] : memref<8x128xf32, #tpu.memory_space<vmem>>, vector<1x128xf32>
      tpu.vector_store %arg6[%c0_17, %c0_18], %19 {strides = array<i32>} : memref<8x128xf32, #tpu.memory_space<vmem>>, vector<1x128xf32>,
      %21 = arith.mulf %15, %15 : vector<32x128xf32>
      %cst_19 = arith.constant dense<0.000000e+00> : vector<128xf32>
      %22 = vector.multi_reduction <add>, %21, %cst_19 [0] : vector<32x128xf32> to vector<128xf32>
      %23 = vector.shape_cast %22 : vector<128xf32> to vector<1x128xf32>
      %c1 = arith.constant 1 : index
      %c0_20 = arith.constant 0 : index
      %24 = vector.load %arg6[%c1, %c0_20] : memref<8x128xf32, #tpu.memory_space<vmem>>, vector<1x128xf32>
      tpu.vector_store %arg6[%c1, %c0_20], %23 {strides = array<i32>} : memref<8x128xf32, #tpu.memory_space<vmem>>, vector<1x128xf32>,
    } else {
    }
    return
  }
  func.func @transform_0(%arg0: i32, %arg1: i32) -> (i32, i32) {
    %c0_i32 = arith.constant 0 : i32
    return %arg0, %arg1 : i32, i32
  }
  func.func @transform_1(%arg0: i32, %arg1: i32) -> (i32, i32) {
    %c0_i32 = arith.constant 0 : i32
    %c0_i32_0 = arith.constant 0 : i32
    return %arg1, %c0_i32 : i32, i32
  }
  func.func @transform_2(%arg0: i32, %arg1: i32) -> (i32, i32) {
    %c0_i32 = arith.constant 0 : i32
    %c0_i32_0 = arith.constant 0 : i32
    %c0_i32_1 = arith.constant 0 : i32
    return %c0_i32, %c0_i32_0 : i32, i32
  }
  func.func @transform_3(%arg0: i32, %arg1: i32) -> (i32, i32) {
    %c0_i32 = arith.constant 0 : i32
    %c0_i32_0 = arith.constant 0 : i32
    return %arg0, %c0_i32 : i32, i32
  }
  func.func @transform_4(%arg0: i32, %arg1: i32) -> (i32, i32) {
    %c0_i32 = arith.constant 0 : i32
    %c0_i32_0 = arith.constant 0 : i32
    return %arg0, %c0_i32 : i32, i32
  }
}

module attributes {stable_mosaic.version = 11 : i64} {
  func.func @_conv_matmul_kernel(%arg0: i32, %arg1: i32, %arg2: memref<32x1024xbf16, #tpu.memory_space<vmem>>, %arg3: memref<1024x128xbf16, #tpu.memory_space<vmem>>, %arg4: memref<1x128xf32, #tpu.memory_space<vmem>>, %arg5: memref<32x128xbf16, #tpu.memory_space<vmem>>, %arg6: memref<8x128xf32, #tpu.memory_space<vmem>>, %arg7: memref<32x128xf32, #tpu.memory_space<vmem>>) attributes {dimension_semantics = [#tpu.dimension_semantics<parallel>, #tpu.dimension_semantics<arbitrary>], iteration_bounds = array<i64: 1, 1>, scalar_prefetch = 0 : i64, scratch_operands = 1 : i64, tpu.core_type = #tpu.core_type<tc>, window_params = [{transform_indices = @transform_0, window_bounds = array<i64: 32, 1024>}, {transform_indices = @transform_1, window_bounds = array<i64: 1024, 128>}, {pipeline_mode = #tpu.pipeline_mode<synchronous>, transform_indices = @transform_2, window_bounds = array<i64: 1, 128>}, {transform_indices = @transform_3, window_bounds = array<i64: 32, 128>}, {transform_indices = @transform_4, window_bounds = array<i64: 8, 128>}]} {
    %c0_i32 = arith.constant 0 : i32
    %0 = arith.cmpi eq, %arg1, %c0_i32 : i32
    %1 = arith.extui %0 : i1 to i32
    %c0_i32_0 = arith.constant 0 : i32
    %2 = arith.cmpi ne, %1, %c0_i32_0 : i32
    scf.if %2 {
      %cst_10 = arith.constant 0.000000e+00 : f32
      %12 = vector.broadcast %cst_10 : f32 to vector<32x128xf32>
      %c0_11 = arith.constant 0 : index
      %c0_12 = arith.constant 0 : index
      %13 = vector.load %arg7[%c0_11, %c0_12] : memref<32x128xf32, #tpu.memory_space<vmem>>, vector<32x128xf32>
      tpu.vector_store %arg7[%c0_11, %c0_12], %12 {strides = array<i32>} : memref<32x128xf32, #tpu.memory_space<vmem>>, vector<32x128xf32>,
    } else {
    }
    %c0 = arith.constant 0 : index
    %c0_1 = arith.constant 0 : index
    %3 = vector.load %arg7[%c0, %c0_1] : memref<32x128xf32, #tpu.memory_space<vmem>>, vector<32x128xf32>
    %c0_2 = arith.constant 0 : index
    %c0_3 = arith.constant 0 : index
    %4 = vector.load %arg2[%c0_2, %c0_3] : memref<32x1024xbf16, #tpu.memory_space<vmem>>, vector<32x1024xbf16>
    %c0_4 = arith.constant 0 : index
    %c0_5 = arith.constant 0 : index
    %5 = vector.load %arg3[%c0_4, %c0_5] : memref<1024x128xbf16, #tpu.memory_space<vmem>>, vector<1024x128xbf16>
    %cst = arith.constant dense<0.000000e+00> : vector<32x128xf32>
    %6 = tpu.matmul %4, %5, %cst {dimension_numbers = #tpu.dot_dimension_numbers<[1], [0], [0], [1], [0, 0, 1, 1], [], []>} : vector<32x1024xbf16>, vector<1024x128xbf16>, vector<32x128xf32> -> vector<32x128xf32>
    %7 = arith.addf %3, %6 : vector<32x128xf32>
    %c0_6 = arith.constant 0 : index
    %c0_7 = arith.constant 0 : index
    %8 = vector.load %arg7[%c0_6, %c0_7] : memref<32x128xf32, #tpu.memory_space<vmem>>, vector<32x128xf32>
    tpu.vector_store %arg7[%c0_6, %c0_7], %7 {strides = array<i32>} : memref<32x128xf32, #tpu.memory_space<vmem>>, vector<32x128xf32>,
    %c0_i32_8 = arith.constant 0 : i32
    %9 = arith.cmpi eq, %arg1, %c0_i32_8 : i32
    %10 = arith.extui %9 : i1 to i32
    %c0_i32_9 = arith.constant 0 : i32
    %11 = arith.cmpi ne, %10, %c0_i32_9 : i32
    scf.if %11 {
      %c0_10 = arith.constant 0 : index
      %c0_11 = arith.constant 0 : index
      %12 = vector.load %arg7[%c0_10, %c0_11] : memref<32x128xf32, #tpu.memory_space<vmem>>, vector<32x128xf32>
      %c0_12 = arith.constant 0 : index
      %c0_13 = arith.constant 0 : index
      %13 = vector.load %arg4[%c0_12, %c0_13] : memref<1x128xf32, #tpu.memory_space<vmem>>, vector<1x128xf32>
      %14 = vector.broadcast %13 : vector<1x128xf32> to vector<32x128xf32>
      %15 = arith.addf %12, %14 : vector<32x128xf32>
      %16 = arith.truncf %15 : vector<32x128xf32> to vector<32x128xbf16>
      %c0_14 = arith.constant 0 : index
      %c0_15 = arith.constant 0 : index
      %17 = vector.load %arg5[%c0_14, %c0_15] : memref<32x128xbf16, #tpu.memory_space<vmem>>, vector<32x128xbf16>
      tpu.vector_store %arg5[%c0_14, %c0_15], %16 {strides = array<i32>} : memref<32x128xbf16, #tpu.memory_space<vmem>>, vector<32x128xbf16>,
      %cst_16 = arith.constant dense<0.000000e+00> : vector<128xf32>
      %18 = vector.multi_reduction <add>, %15, %cst_16 [0] : vector<32x128xf32> to vector<128xf32>
      %19 = vector.shape_cast %18 : vector<128xf32> to vector<1x128xf32>
      %c0_17 = arith.constant 0 : index
      %c0_18 = arith.constant 0 : index
      %20 = vector.load %arg6[%c0_17, %c0_18] : memref<8x128xf32, #tpu.memory_space<vmem>>, vector<1x128xf32>
      tpu.vector_store %arg6[%c0_17, %c0_18], %19 {strides = array<i32>} : memref<8x128xf32, #tpu.memory_space<vmem>>, vector<1x128xf32>,
      %21 = arith.mulf %15, %15 : vector<32x128xf32>
      %cst_19 = arith.constant dense<0.000000e+00> : vector<128xf32>
      %22 = vector.multi_reduction <add>, %21, %cst_19 [0] : vector<32x128xf32> to vector<128xf32>
      %23 = vector.shape_cast %22 : vector<128xf32> to vector<1x128xf32>
      %c1 = arith.constant 1 : index
      %c0_20 = arith.constant 0 : index
      %24 = vector.load %arg6[%c1, %c0_20] : memref<8x128xf32, #tpu.memory_space<vmem>>, vector<1x128xf32>
      tpu.vector_store %arg6[%c1, %c0_20], %23 {strides = array<i32>} : memref<8x128xf32, #tpu.memory_space<vmem>>, vector<1x128xf32>,
    } else {
    }
    return
  }
  func.func @transform_0(%arg0: i32, %arg1: i32) -> (i32, i32) {
    %c0_i32 = arith.constant 0 : i32
    return %arg0, %arg1 : i32, i32
  }
  func.func @transform_1(%arg0: i32, %arg1: i32) -> (i32, i32) {
    %c0_i32 = arith.constant 0 : i32
    %c0_i32_0 = arith.constant 0 : i32
    return %arg1, %c0_i32 : i32, i32
  }
  func.func @transform_2(%arg0: i32, %arg1: i32) -> (i32, i32) {
    %c0_i32 = arith.constant 0 : i32
    %c0_i32_0 = arith.constant 0 : i32
    %c0_i32_1 = arith.constant 0 : i32
    return %c0_i32, %c0_i32_0 : i32, i32
  }
  func.func @transform_3(%arg0: i32, %arg1: i32) -> (i32, i32) {
    %c0_i32 = arith.constant 0 : i32
    %c0_i32_0 = arith.constant 0 : i32
    return %arg0, %c0_i32 : i32, i32
  }
  func.func @transform_4(%arg0: i32, %arg1: i32) -> (i32, i32) {
    %c0_i32 = arith.constant 0 : i32
    %c0_i32_0 = arith.constant 0 : i32
    return %arg0, %c0_i32 : i32, i32
  }
}

module attributes {stable_mosaic.version = 11 : i64} {
  func.func @_conv_matmul_kernel(%arg0: i32, %arg1: i32, %arg2: memref<16x1024xbf16, #tpu.memory_space<vmem>>, %arg3: memref<1024x128xbf16, #tpu.memory_space<vmem>>, %arg4: memref<1x128xf32, #tpu.memory_space<vmem>>, %arg5: memref<16x128xf32, #tpu.memory_space<vmem>>, %arg6: memref<16x128xf32, #tpu.memory_space<vmem>>) attributes {dimension_semantics = [#tpu.dimension_semantics<parallel>, #tpu.dimension_semantics<arbitrary>], iteration_bounds = array<i64: 1, 2>, scalar_prefetch = 0 : i64, scratch_operands = 1 : i64, tpu.core_type = #tpu.core_type<tc>, window_params = [{transform_indices = @transform_0, window_bounds = array<i64: 16, 1024>}, {transform_indices = @transform_1, window_bounds = array<i64: 1024, 128>}, {pipeline_mode = #tpu.pipeline_mode<synchronous>, transform_indices = @transform_2, window_bounds = array<i64: 1, 128>}, {transform_indices = @transform_3, window_bounds = array<i64: 16, 128>}]} {
    %c0_i32 = arith.constant 0 : i32
    %0 = arith.cmpi eq, %arg1, %c0_i32 : i32
    %1 = arith.extui %0 : i1 to i32
    %c0_i32_0 = arith.constant 0 : i32
    %2 = arith.cmpi ne, %1, %c0_i32_0 : i32
    scf.if %2 {
      %cst_9 = arith.constant 0.000000e+00 : f32
      %12 = vector.broadcast %cst_9 : f32 to vector<16x128xf32>
      %c0_10 = arith.constant 0 : index
      %c0_11 = arith.constant 0 : index
      %13 = vector.load %arg6[%c0_10, %c0_11] : memref<16x128xf32, #tpu.memory_space<vmem>>, vector<16x128xf32>
      tpu.vector_store %arg6[%c0_10, %c0_11], %12 {strides = array<i32>} : memref<16x128xf32, #tpu.memory_space<vmem>>, vector<16x128xf32>,
    } else {
    }
    %c0 = arith.constant 0 : index
    %c0_1 = arith.constant 0 : index
    %3 = vector.load %arg6[%c0, %c0_1] : memref<16x128xf32, #tpu.memory_space<vmem>>, vector<16x128xf32>
    %c0_2 = arith.constant 0 : index
    %c0_3 = arith.constant 0 : index
    %4 = vector.load %arg2[%c0_2, %c0_3] : memref<16x1024xbf16, #tpu.memory_space<vmem>>, vector<16x1024xbf16>
    %c0_4 = arith.constant 0 : index
    %c0_5 = arith.constant 0 : index
    %5 = vector.load %arg3[%c0_4, %c0_5] : memref<1024x128xbf16, #tpu.memory_space<vmem>>, vector<1024x128xbf16>
    %cst = arith.constant dense<0.000000e+00> : vector<16x128xf32>
    %6 = tpu.matmul %4, %5, %cst {dimension_numbers = #tpu.dot_dimension_numbers<[1], [0], [0], [1], [0, 0, 1, 1], [], []>} : vector<16x1024xbf16>, vector<1024x128xbf16>, vector<16x128xf32> -> vector<16x128xf32>
    %7 = arith.addf %3, %6 : vector<16x128xf32>
    %c0_6 = arith.constant 0 : index
    %c0_7 = arith.constant 0 : index
    %8 = vector.load %arg6[%c0_6, %c0_7] : memref<16x128xf32, #tpu.memory_space<vmem>>, vector<16x128xf32>
    tpu.vector_store %arg6[%c0_6, %c0_7], %7 {strides = array<i32>} : memref<16x128xf32, #tpu.memory_space<vmem>>, vector<16x128xf32>,
    %c1_i32 = arith.constant 1 : i32
    %9 = arith.cmpi eq, %arg1, %c1_i32 : i32
    %10 = arith.extui %9 : i1 to i32
    %c0_i32_8 = arith.constant 0 : i32
    %11 = arith.cmpi ne, %10, %c0_i32_8 : i32
    scf.if %11 {
      %c0_9 = arith.constant 0 : index
      %c0_10 = arith.constant 0 : index
      %12 = vector.load %arg6[%c0_9, %c0_10] : memref<16x128xf32, #tpu.memory_space<vmem>>, vector<16x128xf32>
      %c0_11 = arith.constant 0 : index
      %c0_12 = arith.constant 0 : index
      %13 = vector.load %arg4[%c0_11, %c0_12] : memref<1x128xf32, #tpu.memory_space<vmem>>, vector<1x128xf32>
      %14 = vector.broadcast %13 : vector<1x128xf32> to vector<16x128xf32>
      %15 = arith.addf %12, %14 : vector<16x128xf32>
      %c0_13 = arith.constant 0 : index
      %c0_14 = arith.constant 0 : index
      %16 = vector.load %arg5[%c0_13, %c0_14] : memref<16x128xf32, #tpu.memory_space<vmem>>, vector<16x128xf32>
      tpu.vector_store %arg5[%c0_13, %c0_14], %15 {strides = array<i32>} : memref<16x128xf32, #tpu.memory_space<vmem>>, vector<16x128xf32>,
    } else {
    }
    return
  }
  func.func @transform_0(%arg0: i32, %arg1: i32) -> (i32, i32) {
    %c0_i32 = arith.constant 0 : i32
    return %arg0, %arg1 : i32, i32
  }
  func.func @transform_1(%arg0: i32, %arg1: i32) -> (i32, i32) {
    %c0_i32 = arith.constant 0 : i32
    %c0_i32_0 = arith.constant 0 : i32
    return %arg1, %c0_i32 : i32, i32
  }
  func.func @transform_2(%arg0: i32, %arg1: i32) -> (i32, i32) {
    %c0_i32 = arith.constant 0 : i32
    %c0_i32_0 = arith.constant 0 : i32
    %c0_i32_1 = arith.constant 0 : i32
    return %c0_i32, %c0_i32_0 : i32, i32
  }
  func.func @transform_3(%arg0: i32, %arg1: i32) -> (i32, i32) {
    %c0_i32 = arith.constant 0 : i32
    %c0_i32_0 = arith.constant 0 : i32
    return %arg0, %c0_i32 : i32, i32
  }
}

</mosaic_0001>

<bundles_post_ra>
// kernel: _lambda_.5
= control target key start
LH: loop header
LB: loop body
LE: loop exit
PB: predicated region body
PF: predicated region fallthrough
CT: control target
= control target key end

     0   :  { %s2388_s1 = inlined_call_operand.vmem [shape: bf16[128,128], index: 1, kind: input, shape index: {}]   ;;  %s2389_s0 = inlined_call_operand.vmem [shape: bf16[512,128], index: 0, kind: input, shape index: {}]   ;;  %s2390_s2 = inlined_call_operand.vmem [shape: f32[1,128], index: 2, kind: input, shape index: {}]   ;;  %s2391_s3 = inlined_call_operand.vmem [shape: bf16[512,128], index: 3, kind: output, shape index: {}]  }
   0x1   :  { %v2034_v0 = vld [vmem:[%s2388_s1] sm:$0xff]   ;;  %v2035_v1 = vld [vmem:[%s2388_s1 + $0x8] sm:$0xff]   ;;  %v2036_v2 = vld [vmem:[%s2388_s1 + $0x10] sm:$0xff]  }
   0x2   :  { %1938 = vmatprep.subr.bf16.mxu0 %v2034_v0  ;;  %2018 = vmatprep.subr.bf16.mxu1 %v2034_v0  ;;  %v2037_v3 = vld [vmem:[%s2388_s1 + $0x18] sm:$0xff]   ;;  %v2042_v4 = vld [vmem:[%s2389_s0] sm:$0xff]   ;;  %v2039_v7 = vld [vmem:[%s2388_s1 + $0x28] sm:$0xff]  }
   0x3   :  { %1939 = vmatpush3.bf16.msra.mxu0 %v2034_v0  ;;  %2026 = vmatpush3.bf16.msra.mxu1 %v2034_v0  ;;  %v2043_v5 = vld [vmem:[%s2389_s0 + $0x80] sm:$0xff]   ;;  %v2040_v8 = vld [vmem:[%s2388_s1 + $0x30] sm:$0xff]   ;;  %v2041_v9 = vld [vmem:[%s2388_s1 + $0x38] sm:$0xff]  }
   0x4   :  { %1940 = vmatprep.subr.bf16.mxu0 %v2035_v1  ;;  %2019 = vmatprep.subr.bf16.mxu1 %v2035_v1  ;;  %v2038_v6 = vld [vmem:[%s2388_s1 + $0x20] sm:$0xff]   ;;  %v2044_v10 = vld [vmem:[%s2389_s0 + $0x8] sm:$0xff]   ;;  %v2046_v12 = vld [vmem:[%s2389_s0 + $0x10] sm:$0xff]  }
   0x5   :  { %1954 = vmatprep.mubr.bf16.mxu0 %v2042_v4  ;;  %1986 = vmatprep.mubr.bf16.mxu1 %v2043_v5  ;;  %v2045_v11 = vld [vmem:[%s2389_s0 + $0x88] sm:$0xff]   ;;  %v2047_v13 = vld [vmem:[%s2389_s0 + $0x90] sm:$0xff]   ;;  %v2048_v14 = vld [vmem:[%s2389_s0 + $0x18] sm:$0xff]  }
   0x6   :  { %v2049_v15 = vld [vmem:[%s2389_s0 + $0x98] sm:$0xff]   ;;  %v2050_v16 = vld [vmem:[%s2389_s0 + $0x20] sm:$0xff]   ;;  %v2052_v18 = vld [vmem:[%s2389_s0 + $0x28] sm:$0xff]  }
   0x7   :  { %1941 = vmatpush3.bf16.msra.mxu0 %v2035_v1  ;;  %2027 = vmatpush3.bf16.msra.mxu1 %v2035_v1  ;;  %v2051_v17 = vld [vmem:[%s2389_s0 + $0xa0] sm:$0xff]   ;;  %v2053_v19 = vld [vmem:[%s2389_s0 + $0xa8] sm:$0xff]   ;;  %v2054_v20 = vld [vmem:[%s2389_s0 + $0x30] sm:$0xff]  }
   0x8   :  { %1942 = vmatprep.subr.bf16.mxu0 %v2036_v2  ;;  %2020 = vmatprep.subr.bf16.mxu1 %v2036_v2  ;;  %v2055_v21 = vld [vmem:[%s2389_s0 + $0xb0] sm:$0xff]   ;;  %v2056_v22 = vld [vmem:[%s2389_s0 + $0x38] sm:$0xff]   ;;  %v2058_v24 = vld [vmem:[%s2389_s0 + $0x40] sm:$0xff]  }
   0x9   :  { %v2057_v23 = vld [vmem:[%s2389_s0 + $0xb8] sm:$0xff]   ;;  %v2059_v25 = vld [vmem:[%s2389_s0 + $0xc0] sm:$0xff]   ;;  %v2060_v26 = vld [vmem:[%s2389_s0 + $0x48] sm:$0xff]  }
   0xa   :  { %v2061_v27 = vld [vmem:[%s2389_s0 + $0xc8] sm:$0xff]   ;;  %v2062_v28 = vld [vmem:[%s2389_s0 + $0x50] sm:$0xff]   ;;  %v2064_v30 = vld [vmem:[%s2389_s0 + $0x58] sm:$0xff]  }
   0xb   :  { %1943 = vmatpush3.bf16.msra.mxu0 %v2036_v2  ;;  %2028 = vmatpush3.bf16.msra.mxu1 %v2036_v2  ;;  %v2063_v29 = vld [vmem:[%s2389_s0 + $0xd0] sm:$0xff]   ;;  %v2065_v31 = vld [vmem:[%s2389_s0 + $0xd8] sm:$0xff]   ;;  %v2066_v32 = vld [vmem:[%s2389_s0 + $0x60] sm:$0xff]  }
   0xc   :  { %1944 = vmatprep.subr.bf16.mxu0 %v2037_v3  ;;  %2021 = vmatprep.subr.bf16.mxu1 %v2037_v3  ;;  %v2067_v33 = vld [vmem:[%s2389_s0 + $0xe0] sm:$0xff]   ;;  %v2068_v34 = vld [vmem:[%s2389_s0 + $0x68] sm:$0xff]   ;;  %v2070_v36 = vld [vmem:[%s2389_s0 + $0x70] sm:$0xff]  }
   0xd   :  { %v2069_v35 = vld [vmem:[%s2389_s0 + $0xe8] sm:$0xff]   ;;  %v2071_v37 = vld [vmem:[%s2389_s0 + $0xf0] sm:$0xff]   ;;  %v2072_v38 = vld [vmem:[%s2389_s0 + $0x78] sm:$0xff]  }
   0xe   :  { %v2073_v39 = vld [vmem:[%s2389_s0 + $0xf8] sm:$0xff]   ;;  %v2217_v40 = vld [vmem:[%s2390_s2] ss:$0 sm:$0xff] }
   0xf   :  { %1945 = vmatpush3.bf16.msra.mxu0 %v2037_v3  ;;  %2029 = vmatpush3.bf16.msra.mxu1 %v2037_v3 }
  0x10   :  { %1946 = vmatprep.subr.bf16.mxu0 %v2038_v6  ;;  %2022 = vmatprep.subr.bf16.mxu1 %v2038_v6 }
  0x13   :  { %1947 = vmatpush3.bf16.msra.mxu0 %v2038_v6  ;;  %2030 = vmatpush3.bf16.msra.mxu1 %v2038_v6 }
  0x14   :  { %1948 = vmatprep.subr.bf16.mxu0 %v2039_v7  ;;  %2023 = vmatprep.subr.bf16.mxu1 %v2039_v7 }
  0x17   :  { %1949 = vmatpush3.bf16.msra.mxu0 %v2039_v7  ;;  %2031 = vmatpush3.bf16.msra.mxu1 %v2039_v7 }
  0x18   :  { %1950 = vmatprep.subr.bf16.mxu0 %v2040_v8  ;;  %2024 = vmatprep.subr.bf16.mxu1 %v2040_v8 }
  0x1b   :  { %1951 = vmatpush3.bf16.msra.mxu0 %v2040_v8  ;;  %2032 = vmatpush3.bf16.msra.mxu1 %v2040_v8 }
  0x1c   :  { %1952 = vmatprep.subr.bf16.mxu0 %v2041_v9  ;;  %2025 = vmatprep.subr.bf16.mxu1 %v2041_v9 }
  0x1f   :  { %1953 = vmatpush3.bf16.msra.mxu0 %v2041_v9  ;;  %2033 = vmatpush3.bf16.msra.mxu1 %v2041_v9 }
  0x22   :  { %1955 = vmatmul.mubr.bf16.vlgmr.msra.gmra.mrb[0].mxu0 %v2044_v10  ;;  %1987 = vmatmul.mubr.bf16.vlgmr.msra.gmra.mrb[0].mxu1 %v2045_v11 }
  0x23   :  { %1958 = vmatprep.mubr.bf16.mxu0 %v2046_v12  ;;  %1990 = vmatprep.mubr.bf16.mxu1 %v2047_v13 }
  0x2a   :  { %1959 = vmatmul.mubr.bf16.gmra.mrb[4].mxu0 %v2048_v14  ;;  %1991 = vmatmul.mubr.bf16.gmra.mrb[4].mxu1 %v2049_v15 }
  0x2b   :  { %1962 = vmatprep.mubr.bf16.mxu0 %v2050_v16  ;;  %1994 = vmatprep.mubr.bf16.mxu1 %v2051_v17 }
  0x32   :  { %1963 = vmatmul.mubr.bf16.gmra.mrb[8].mxu0 %v2052_v18  ;;  %1995 = vmatmul.mubr.bf16.gmra.mrb[8].mxu1 %v2053_v19 }
  0x33   :  { %1966 = vmatprep.mubr.bf16.mxu0 %v2054_v20  ;;  %1998 = vmatprep.mubr.bf16.mxu1 %v2055_v21 }
  0x3a   :  { %1967 = vmatmul.mubr.bf16.gmra.mrb[12].mxu0 %v2056_v22  ;;  %1999 = vmatmul.mubr.bf16.gmra.mrb[12].mxu1 %v2057_v23 }
  0x3b   :  { %1970 = vmatprep.mubr.bf16.mxu0 %v2058_v24  ;;  %2002 = vmatprep.mubr.bf16.mxu1 %v2059_v25 }
  0x42   :  { %1971 = vmatmul.mubr.bf16.gmra.mrb[16].mxu0 %v2060_v26  ;;  %2003 = vmatmul.mubr.bf16.gmra.mrb[16].mxu1 %v2061_v27 }
  0x43   :  { %1974 = vmatprep.mubr.bf16.mxu0 %v2062_v28  ;;  %2006 = vmatprep.mubr.bf16.mxu1 %v2063_v29 }
  0x4a   :  { %1975 = vmatmul.mubr.bf16.gmra.mrb[20].mxu0 %v2064_v30  ;;  %2007 = vmatmul.mubr.bf16.gmra.mrb[20].mxu1 %v2065_v31 }
  0x4b   :  { %1978 = vmatprep.mubr.bf16.mxu0 %v2066_v32  ;;  %2010 = vmatprep.mubr.bf16.mxu1 %v2067_v33 }
  0x52   :  { %1979 = vmatmul.mubr.bf16.gmra.mrb[24].mxu0 %v2068_v34  ;;  %2011 = vmatmul.mubr.bf16.gmra.mrb[24].mxu1 %v2069_v35 }
  0x53   :  { %1982 = vmatprep.mubr.bf16.mxu0 %v2070_v36  ;;  %2014 = vmatprep.mubr.bf16.mxu1 %v2071_v37 }
  0x5a   :  { %1983 = vmatmul.mubr.bf16.gmra.mrb[28].mxu0 %v2072_v38  ;;  %2015 = vmatmul.mubr.bf16.gmra.mrb[28].mxu1 %v2073_v39 }
  0xf5   :  { %v1956_v41 = vpop.f32.mrb[0].mxu0  ;;  %v1988_v42 = vpop.f32.mrb[0].mxu1 }
  0xf6   :  { %v960_v43 = vadd.f32 %v1956_v41, %v2217_v40  ;;  %v992_v44 = vadd.f32 %v1988_v42, %v2217_v40  ;;  %v501_v45 = vpop.f32.mrb[1].mxu0  ;;  %v629_v46 = vpop.f32.mrb[1].mxu1 }
  0xf7   :  { %v958_v47 = vadd.f32 %v2217_v40, %v501_v45  ;;  %v990_v48 = vadd.f32 %v2217_v40, %v629_v46  ;;  %v1957_v49 = vpop.f32.mrb[2].mxu0  ;;  %v1989_v50 = vpop.f32.mrb[2].mxu1 }
  0xf8   :  { %vm1024_vm0 = vcmp.gt.f32.partialorder %v960_v43, 0.0  ;;  %v1088_v51 = vmul.f32 0.2, %v960_v43  ;;  %vm1056_vm1 = vcmp.gt.f32.partialorder %v992_v44, 0.0  ;;  %v1120_v52 = vmul.f32 0.2, %v992_v44 }
  0xf9   :  { %vm1022_vm2 = vcmp.gt.f32.partialorder %v958_v47, 0.0  ;;  %v1086_v53 = vmul.f32 0.2, %v958_v47  ;;  %vm1054_vm3 = vcmp.gt.f32.partialorder %v990_v48, 0.0  ;;  %v1118_v54 = vmul.f32 0.2, %v990_v48 }
  0xfa   :  { %v961_v55 = vadd.f32 %v1957_v49, %v2217_v40  ;;  %v993_v56 = vadd.f32 %v1989_v50, %v2217_v40  ;;  %v504_v57 = vpop.f32.mrb[3].mxu0  ;;  %v632_v58 = vpop.f32.mrb[3].mxu1  ;;  %v1152_v59 = vsel %vm1024_vm0, %v960_v43, %v1088_v51  ;;  %v1184_v60 = vsel %vm1056_vm1, %v992_v44, %v1120_v52 }
  0xfb   :  { %v959_v61 = vadd.f32 %v2217_v40, %v504_v57  ;;  %v991_v62 = vadd.f32 %v2217_v40, %v632_v58  ;;  %v1150_v3 = vsel %vm1022_vm2, %v958_v47, %v1086_v53  ;;  %v1182_v4 = vsel %vm1054_vm3, %v990_v48, %v1118_v54 }
  0xfc   :  { %vm1025_vm4 = vcmp.gt.f32.partialorder %v961_v55, 0.0  ;;  %v1089_v63 = vmul.f32 0.2, %v961_v55  ;;  %vm1057_vm5 = vcmp.gt.f32.partialorder %v993_v56, 0.0  ;;  %v1121_v0 = vmul.f32 0.2, %v993_v56 }
  0xfd   :  { %vm1023_vm6 = vcmp.gt.f32.partialorder %v959_v61, 0.0  ;;  %v1087_v1 = vmul.f32 0.2, %v959_v61  ;;  %vm1055_vm7 = vcmp.gt.f32.partialorder %v991_v62, 0.0  ;;  %v1119_v2 = vmul.f32 0.2, %v991_v62 }
  0xfe   :  { %v1153_v5 = vsel %vm1025_vm4, %v961_v55, %v1089_v63  ;;  %v1185_v6 = vsel %vm1057_vm5, %v993_v56, %v1121_v0  ;;  %v1960_v7 = vpop.f32.mrb[4].mxu0  ;;  %v1992_v8 = vpop.f32.mrb[4].mxu1 }
  0xff   :  { %v1715_v9 = vpack.c.bf16 %v1153_v5, %v1152_v59  ;;  %v1795_v10 = vpack.c.bf16 %v1185_v6, %v1184_v60  ;;  %v1151_v11 = vsel %vm1023_vm6, %v959_v61, %v1087_v1  ;;  %v1183_v12 = vsel %vm1055_vm7, %v991_v62, %v1119_v2  ;;  %v517_v13 = vpop.f32.mrb[5].mxu0  ;;  %v645_v14 = vpop.f32.mrb[5].mxu1 }
 0x100   :  { %v1710_v15 = vpack.c.bf16 %v1151_v11, %v1150_v3  ;;  %v1790_v16 = vpack.c.bf16 %v1183_v12, %v1182_v4  ;;  %v964_v17 = vadd.f32 %v1960_v7, %v2217_v40  ;;  %v996_v18 = vadd.f32 %v1992_v8, %v2217_v40  ;;  %v1961_v19 = vpop.f32.mrb[6].mxu0  ;;  %v1993_v20 = vpop.f32.mrb[6].mxu1 }
 0x101   :  { %1867 = vst [vmem:[%s2391_s3 + $0x8] sm:$0xff] %v1715_v9   ;;  %1883 = vst [vmem:[%s2391_s3 + $0x88] sm:$0xff] %v1795_v10   ;;  %v962_v21 = vadd.f32 %v2217_v40, %v517_v13  ;;  %v994_v22 = vadd.f32 %v2217_v40, %v645_v14  ;;  %v965_v23 = vadd.f32 %v1961_v19, %v2217_v40  ;;  %v520_v25 = vpop.f32.mrb[7].mxu0  ;;  %v648_v26 = vpop.f32.mrb[7].mxu1 }
 0x102   :  { %v997_v24 = vadd.f32 %v1993_v20, %v2217_v40  ;;  %1711 = vst [vmem:[%s2391_s3] sm:$0xff] %v1710_v15   ;;  %1882 = vst [vmem:[%s2391_s3 + $0x80] sm:$0xff] %v1790_v16   ;;  %vm1028_vm8 = vcmp.gt.f32.partialorder %v964_v17, 0.0  ;;  %v1092_v27 = vmul.f32 0.2, %v964_v17  ;;  %vm1060_vm9 = vcmp.gt.f32.partialorder %v996_v18, 0.0 }
 0x103   :  { %v1124_v28 = vmul.f32 0.2, %v996_v18  ;;  %vm1026_vm10 = vcmp.gt.f32.partialorder %v962_v21, 0.0  ;;  %v1090_v29 = vmul.f32 0.2, %v962_v21  ;;  %vm1058_vm11 = vcmp.gt.f32.partialorder %v994_v22, 0.0 }
 0x104   :  { %v1122_v30 = vmul.f32 0.2, %v994_v22  ;;  %v1156_v31 = vsel %vm1028_vm8, %v964_v17, %v1092_v27  ;;  %vm1029_vm12 = vcmp.gt.f32.partialorder %v965_v23, 0.0  ;;  %v1093_v33 = vmul.f32 0.2, %v965_v23 }
 0x105   :  { %v1188_v32 = vsel %vm1060_vm9, %v996_v18, %v1124_v28  ;;  %v1154_v34 = vsel %vm1026_vm10, %v962_v21, %v1090_v29  ;;  %vm1061_vm13 = vcmp.gt.f32.partialorder %v997_v24, 0.0  ;;  %v1125_v36 = vmul.f32 0.2, %v997_v24  ;;  %v1964_v37 = vpop.f32.mrb[8].mxu0  ;;  %v1996_v38 = vpop.f32.mrb[8].mxu1 }
 0x106   :  { %v1186_v35 = vsel %vm1058_vm11, %v994_v22, %v1122_v30  ;;  %v1157_v39 = vsel %vm1029_vm12, %v965_v23, %v1093_v33  ;;  %v963_v41 = vadd.f32 %v2217_v40, %v520_v25  ;;  %v995_v42 = vadd.f32 %v2217_v40, %v648_v26  ;;  %v533_v44 = vpop.f32.mrb[9].mxu0  ;;  %v661_v45 = vpop.f32.mrb[9].mxu1 }
 0x107   :  { %v968_v43 = vadd.f32 %v1964_v37, %v2217_v40  ;;  %v1725_v46 = vpack.c.bf16 %v1157_v39, %v1156_v31  ;;  %v1189_v47 = vsel %vm1061_vm13, %v997_v24, %v1125_v36  ;;  %v1000_v48 = vadd.f32 %v1996_v38, %v2217_v40  ;;  %v1965_v50 = vpop.f32.mrb[10].mxu0  ;;  %v1997_v51 = vpop.f32.mrb[10].mxu1 }
 0x108   :  { %v966_v49 = vadd.f32 %v2217_v40, %v533_v44  ;;  %v1805_v52 = vpack.c.bf16 %v1189_v47, %v1188_v32  ;;  %vm1027_vm14 = vcmp.gt.f32.partialorder %v963_v41, 0.0  ;;  %v1091_v53 = vmul.f32 0.2, %v963_v41  ;;  %v536_v54 = vpop.f32.mrb[11].mxu0  ;;  %v664_v55 = vpop.f32.mrb[11].mxu1 }
 0x109   :  { %vm1059_vm15 = vcmp.gt.f32.partialorder %v995_v42, 0.0  ;;  %1869 = vst [vmem:[%s2391_s3 + $0x18] sm:$0xff] %v1725_v46   ;;  %v1123_v56 = vmul.f32 0.2, %v995_v42  ;;  %vm1032_vm0 = vcmp.gt.f32.partialorder %v968_v43, 0.0  ;;  %vm1064_vm1 = vcmp.gt.f32.partialorder %v1000_v48, 0.0 }
 0x10a   :  { %v1096_v57 = vmul.f32 0.2, %v968_v43  ;;  %1885 = vst [vmem:[%s2391_s3 + $0x98] sm:$0xff] %v1805_v52   ;;  %v1155_v58 = vsel %vm1027_vm14, %v963_v41, %v1091_v53  ;;  %v1128_v59 = vmul.f32 0.2, %v1000_v48  ;;  %vm1030_vm2 = vcmp.gt.f32.partialorder %v966_v49, 0.0 }
 0x10b   :  { %v1094_v60 = vmul.f32 0.2, %v966_v49  ;;  %v1720_v61 = vpack.c.bf16 %v1155_v58, %v1154_v34  ;;  %v1187_v62 = vsel %vm1059_vm15, %v995_v42, %v1123_v56  ;;  %v998_v0 = vadd.f32 %v2217_v40, %v661_v45 }
 0x10c   :  { %v1160_v63 = vsel %vm1032_vm0, %v968_v43, %v1096_v57  ;;  %v1800_v1 = vpack.c.bf16 %v1187_v62, %v1186_v35  ;;  %v1192_v2 = vsel %vm1064_vm1, %v1000_v48, %v1128_v59  ;;  %v969_v4 = vadd.f32 %v1965_v50, %v2217_v40 }
 0x10d   :  { %v1158_v3 = vsel %vm1030_vm2, %v966_v49, %v1094_v60  ;;  %1868 = vst [vmem:[%s2391_s3 + $0x10] sm:$0xff] %v1720_v61   ;;  %vm1062_vm3 = vcmp.gt.f32.partialorder %v998_v0, 0.0  ;;  %v1126_v5 = vmul.f32 0.2, %v998_v0  ;;  %v1001_v6 = vadd.f32 %v1997_v51, %v2217_v40  ;;  %v1968_v8 = vpop.f32.mrb[12].mxu0  ;;  %v2000_v9 = vpop.f32.mrb[12].mxu1 }
 0x10e   :  { %v967_v7 = vadd.f32 %v2217_v40, %v536_v54  ;;  %1884 = vst [vmem:[%s2391_s3 + $0x90] sm:$0xff] %v1800_v1   ;;  %vm1033_vm4 = vcmp.gt.f32.partialorder %v969_v4, 0.0  ;;  %v1097_v10 = vmul.f32 0.2, %v969_v4  ;;  %v999_v11 = vadd.f32 %v2217_v40, %v664_v55  ;;  %v549_v13 = vpop.f32.mrb[13].mxu0  ;;  %v677_v14 = vpop.f32.mrb[13].mxu1 }
 0x10f   :  { %v972_v12 = vadd.f32 %v1968_v8, %v2217_v40  ;;  %v1190_v15 = vsel %vm1062_vm3, %v998_v0, %v1126_v5  ;;  %vm1065_vm5 = vcmp.gt.f32.partialorder %v1001_v6, 0.0  ;;  %v1129_v16 = vmul.f32 0.2, %v1001_v6  ;;  %v1969_v17 = vpop.f32.mrb[14].mxu0  ;;  %v2001_v18 = vpop.f32.mrb[14].mxu1 }
 0x110   :  { %vm1031_vm6 = vcmp.gt.f32.partialorder %v967_v7, 0.0  ;;  %v1161_v19 = vsel %vm1033_vm4, %v969_v4, %v1097_v10  ;;  %v1095_v20 = vmul.f32 0.2, %v967_v7  ;;  %vm1063_vm7 = vcmp.gt.f32.partialorder %v999_v11, 0.0  ;;  %v552_v22 = vpop.f32.mrb[15].mxu0  ;;  %v680_v26 = vpop.f32.mrb[15].mxu1 }
 0x111   :  { %v1127_v21 = vmul.f32 0.2, %v999_v11  ;;  %v1735_v23 = vpack.c.bf16 %v1161_v19, %v1160_v63  ;;  %v1193_v24 = vsel %vm1065_vm5, %v1001_v6, %v1129_v16  ;;  %vm1036_vm8 = vcmp.gt.f32.partialorder %v972_v12, 0.0 }
 0x112   :  { %v1100_v25 = vmul.f32 0.2, %v972_v12  ;;  %v1815_v27 = vpack.c.bf16 %v1193_v24, %v1192_v2  ;;  %v1159_v28 = vsel %vm1031_vm6, %v967_v7, %v1095_v20  ;;  %v1004_v30 = vadd.f32 %v2000_v9, %v2217_v40 }
 0x113   :  { %v1191_v29 = vsel %vm1063_vm7, %v999_v11, %v1127_v21  ;;  %1871 = vst [vmem:[%s2391_s3 + $0x28] sm:$0xff] %v1735_v23   ;;  %v1730_v31 = vpack.c.bf16 %v1159_v28, %v1158_v3  ;;  %v970_v34 = vadd.f32 %v2217_v40, %v549_v13  ;;  %v1002_v36 = vadd.f32 %v2217_v40, %v677_v14 }
 0x114   :  { %v1810_v32 = vpack.c.bf16 %v1191_v29, %v1190_v15  ;;  %v1164_v33 = vsel %vm1036_vm8, %v972_v12, %v1100_v25  ;;  %1887 = vst [vmem:[%s2391_s3 + $0xa8] sm:$0xff] %v1815_v27   ;;  %vm1068_vm9 = vcmp.gt.f32.partialorder %v1004_v30, 0.0  ;;  %v1132_v35 = vmul.f32 0.2, %v1004_v30 }
 0x115   :  { %v973_v37 = vadd.f32 %v1969_v17, %v2217_v40  ;;  %1870 = vst [vmem:[%s2391_s3 + $0x20] sm:$0xff] %v1730_v31   ;;  %vm1034_vm10 = vcmp.gt.f32.partialorder %v970_v34, 0.0  ;;  %v1098_v38 = vmul.f32 0.2, %v970_v34  ;;  %v1005_v39 = vadd.f32 %v2001_v18, %v2217_v40  ;;  %v1972_v42 = vpop.f32.mrb[16].mxu0  ;;  %v2004_v43 = vpop.f32.mrb[16].mxu1 }
 0x116   :  { %1886 = vst [vmem:[%s2391_s3 + $0xa0] sm:$0xff] %v1810_v32   ;;  %v971_v41 = vadd.f32 %v2217_v40, %v552_v22  ;;  %v1196_v44 = vsel %vm1068_vm9, %v1004_v30, %v1132_v35  ;;  %vm1066_vm11 = vcmp.gt.f32.partialorder %v1002_v36, 0.0  ;;  %v1130_v45 = vmul.f32 0.2, %v1002_v36  ;;  %v565_v46 = vpop.f32.mrb[17].mxu0  ;;  %v693_v47 = vpop.f32.mrb[17].mxu1 }
 0x117   :  { %vm1037_vm12 = vcmp.gt.f32.partialorder %v973_v37, 0.0  ;;  %v1162_v48 = vsel %vm1034_vm10, %v970_v34, %v1098_v38  ;;  %v1101_v49 = vmul.f32 0.2, %v973_v37  ;;  %vm1069_vm13 = vcmp.gt.f32.partialorder %v1005_v39, 0.0  ;;  %v1973_v51 = vpop.f32.mrb[18].mxu0  ;;  %v2005_v55 = vpop.f32.mrb[18].mxu1 }
 0x118   :  { %v1133_v50 = vmul.f32 0.2, %v1005_v39  ;;  %v1194_v52 = vsel %vm1066_vm11, %v1002_v36, %v1130_v45  ;;  %vm1035_vm14 = vcmp.gt.f32.partialorder %v971_v41, 0.0  ;;  %v1099_v53 = vmul.f32 0.2, %v971_v41  ;;  %v568_v56 = vpop.f32.mrb[19].mxu0 }
 0x119   :  { %v1003_v54 = vadd.f32 %v2217_v40, %v680_v26  ;;  %v1165_v57 = vsel %vm1037_vm12, %v973_v37, %v1101_v49  ;;  %v976_v59 = vadd.f32 %v1972_v42, %v2217_v40  ;;  %v1008_v60 = vadd.f32 %v2004_v43, %v2217_v40  ;;  %v696_v61 = vpop.f32.mrb[19].mxu1 }
 0x11a   :  { %v1197_v58 = vsel %vm1069_vm13, %v1005_v39, %v1133_v50  ;;  %v1745_v62 = vpack.c.bf16 %v1165_v57, %v1164_v33  ;;  %v1163_v0 = vsel %vm1035_vm14, %v971_v41, %v1099_v53  ;;  %v974_v5 = vadd.f32 %v2217_v40, %v565_v46 }
 0x11b   :  { %v1825_v63 = vpack.c.bf16 %v1197_v58, %v1196_v44  ;;  %vm1067_vm15 = vcmp.gt.f32.partialorder %v1003_v54, 0.0  ;;  %v1740_v1 = vpack.c.bf16 %v1163_v0, %v1162_v48  ;;  %v1131_v2 = vmul.f32 0.2, %v1003_v54 }
 0x11c   :  { %vm1040_vm0 = vcmp.gt.f32.partialorder %v976_v59, 0.0  ;;  %v1104_v3 = vmul.f32 0.2, %v976_v59  ;;  %1873 = vst [vmem:[%s2391_s3 + $0x38] sm:$0xff] %v1745_v62   ;;  %vm1072_vm1 = vcmp.gt.f32.partialorder %v1008_v60, 0.0  ;;  %v1006_v6 = vadd.f32 %v2217_v40, %v693_v47 }
 0x11d   :  { %1889 = vst [vmem:[%s2391_s3 + $0xb8] sm:$0xff] %v1825_v63   ;;  %v1136_v4 = vmul.f32 0.2, %v1008_v60  ;;  %1872 = vst [vmem:[%s2391_s3 + $0x30] sm:$0xff] %v1740_v1   ;;  %v1195_v7 = vsel %vm1067_vm15, %v1003_v54, %v1131_v2  ;;  %v977_v9 = vadd.f32 %v1973_v51, %v2217_v40  ;;  %v1009_v10 = vadd.f32 %v2005_v55, %v2217_v40  ;;  %v1976_v11 = vpop.f32.mrb[20].mxu0  ;;  %v2008_v12 = vpop.f32.mrb[20].mxu1 }
 0x11e   :  { %v1168_v8 = vsel %vm1040_vm0, %v976_v59, %v1104_v3  ;;  %v1820_v13 = vpack.c.bf16 %v1195_v7, %v1194_v52  ;;  %vm1038_vm2 = vcmp.gt.f32.partialorder %v974_v5, 0.0  ;;  %v1102_v15 = vmul.f32 0.2, %v974_v5  ;;  %v581_v16 = vpop.f32.mrb[21].mxu0  ;;  %v709_v17 = vpop.f32.mrb[21].mxu1 }
 0x11f   :  { %v1200_v14 = vsel %vm1072_vm1, %v1008_v60, %v1136_v4  ;;  %vm1070_vm3 = vcmp.gt.f32.partialorder %v1006_v6, 0.0  ;;  %v1134_v18 = vmul.f32 0.2, %v1006_v6  ;;  %vm1041_vm4 = vcmp.gt.f32.partialorder %v977_v9, 0.0  ;;  %v1977_v23 = vpop.f32.mrb[22].mxu0  ;;  %v2009_v24 = vpop.f32.mrb[22].mxu1 }
 0x120   :  { %v1105_v19 = vmul.f32 0.2, %v977_v9  ;;  %1888 = vst [vmem:[%s2391_s3 + $0xb0] sm:$0xff] %v1820_v13   ;;  %v1166_v20 = vsel %vm1038_vm2, %v974_v5, %v1102_v15  ;;  %vm1073_vm5 = vcmp.gt.f32.partialorder %v1009_v10, 0.0  ;;  %v1137_v21 = vmul.f32 0.2, %v1009_v10 }
 0x121   :  { %v975_v22 = vadd.f32 %v2217_v40, %v568_v56  ;;  %v1198_v25 = vsel %vm1070_vm3, %v1006_v6, %v1134_v18  ;;  %v1007_v27 = vadd.f32 %v2217_v40, %v696_v61  ;;  %v980_v28 = vadd.f32 %v1976_v11, %v2217_v40  ;;  %v584_v29 = vpop.f32.mrb[23].mxu0  ;;  %v712_v30 = vpop.f32.mrb[23].mxu1 }
 0x122   :  { %v1169_v26 = vsel %vm1041_vm4, %v977_v9, %v1105_v19  ;;  %v1201_v32 = vsel %vm1073_vm5, %v1009_v10, %v1137_v21  ;;  %v1012_v38 = vadd.f32 %v2008_v12, %v2217_v40  ;;  %v978_v39 = vadd.f32 %v2217_v40, %v581_v16 }
 0x123   :  { %v1755_v31 = vpack.c.bf16 %v1169_v26, %v1168_v8  ;;  %vm1039_vm6 = vcmp.gt.f32.partialorder %v975_v22, 0.0  ;;  %v1103_v33 = vmul.f32 0.2, %v975_v22  ;;  %v1835_v34 = vpack.c.bf16 %v1201_v32, %v1200_v14 }
 0x124   :  { %vm1071_vm7 = vcmp.gt.f32.partialorder %v1007_v27, 0.0  ;;  %v1135_v35 = vmul.f32 0.2, %v1007_v27  ;;  %vm1044_vm8 = vcmp.gt.f32.partialorder %v980_v28, 0.0  ;;  %v1108_v37 = vmul.f32 0.2, %v980_v28 }
 0x125   :  { %1875 = vst [vmem:[%s2391_s3 + $0x48] sm:$0xff] %v1755_v31   ;;  %v1167_v36 = vsel %vm1039_vm6, %v975_v22, %v1103_v33  ;;  %1891 = vst [vmem:[%s2391_s3 + $0xc8] sm:$0xff] %v1835_v34   ;;  %v1010_v43 = vadd.f32 %v2217_v40, %v709_v17  ;;  %v981_v44 = vadd.f32 %v1977_v23, %v2217_v40  ;;  %v1980_v45 = vpop.f32.mrb[24].mxu0  ;;  %v2012_v46 = vpop.f32.mrb[24].mxu1  ;;  %vm1076_vm9 = vcmp.gt.f32.partialorder %v1012_v38, 0.0 }
 0x126   :  { %v1750_v41 = vpack.c.bf16 %v1167_v36, %v1166_v20  ;;  %v1199_v42 = vsel %vm1071_vm7, %v1007_v27, %v1135_v35  ;;  %v1140_v48 = vmul.f32 0.2, %v1012_v38  ;;  %v597_v49 = vpop.f32.mrb[25].mxu0  ;;  %v725_v50 = vpop.f32.mrb[25].mxu1  ;;  %v1172_v51 = vsel %vm1044_vm8, %v980_v28, %v1108_v37 }
 0x127   :  { %v1830_v47 = vpack.c.bf16 %v1199_v42, %v1198_v25  ;;  %vm1042_vm10 = vcmp.gt.f32.partialorder %v978_v39, 0.0  ;;  %v1106_v52 = vmul.f32 0.2, %v978_v39  ;;  %v1138_v53 = vmul.f32 0.2, %v1010_v43  ;;  %v1981_v56 = vpop.f32.mrb[26].mxu0 }
 0x128   :  { %1874 = vst [vmem:[%s2391_s3 + $0x40] sm:$0xff] %v1750_v41   ;;  %vm1074_vm11 = vcmp.gt.f32.partialorder %v1010_v43, 0.0  ;;  %vm1045_vm12 = vcmp.gt.f32.partialorder %v981_v44, 0.0  ;;  %v1109_v54 = vmul.f32 0.2, %v981_v44  ;;  %v1013_v55 = vadd.f32 %v2009_v24, %v2217_v40  ;;  %v2013_v57 = vpop.f32.mrb[26].mxu1 }
 0x129   :  { %1890 = vst [vmem:[%s2391_s3 + $0xc0] sm:$0xff] %v1830_v47   ;;  %v1204_v58 = vsel %vm1076_vm9, %v1012_v38, %v1140_v48  ;;  %v1170_v59 = vsel %vm1042_vm10, %v978_v39, %v1106_v52  ;;  %v979_v60 = vadd.f32 %v2217_v40, %v584_v29  ;;  %v1011_v61 = vadd.f32 %v2217_v40, %v712_v30  ;;  %v600_v62 = vpop.f32.mrb[27].mxu0  ;;  %v728_v63 = vpop.f32.mrb[27].mxu1 }
 0x12a   :  { %v1173_v0 = vsel %vm1045_vm12, %v981_v44, %v1109_v54  ;;  %vm1077_vm13 = vcmp.gt.f32.partialorder %v1013_v55, 0.0  ;;  %v1141_v1 = vmul.f32 0.2, %v1013_v55  ;;  %v984_v2 = vadd.f32 %v1980_v45, %v2217_v40 }
 0x12b   :  { %v1765_v3 = vpack.c.bf16 %v1173_v0, %v1172_v51  ;;  %vm1043_vm14 = vcmp.gt.f32.partialorder %v979_v60, 0.0  ;;  %v1107_v4 = vmul.f32 0.2, %v979_v60  ;;  %vm1075_vm15 = vcmp.gt.f32.partialorder %v1011_v61, 0.0 }
 0x12c   :  { %v1205_v5 = vsel %vm1077_vm13, %v1013_v55, %v1141_v1  ;;  %v1139_v6 = vmul.f32 0.2, %v1011_v61  ;;  %vm1048_vm0 = vcmp.gt.f32.partialorder %v984_v2, 0.0  ;;  %v1112_v7 = vmul.f32 0.2, %v984_v2 }
 0x12d   :  { %1877 = vst [vmem:[%s2391_s3 + $0x58] sm:$0xff] %v1765_v3   ;;  %v1845_v8 = vpack.c.bf16 %v1205_v5, %v1204_v58  ;;  %v1171_v9 = vsel %vm1043_vm14, %v979_v60, %v1107_v4  ;;  %v1016_v10 = vadd.f32 %v2012_v46, %v2217_v40  ;;  %v982_v11 = vadd.f32 %v2217_v40, %v597_v49  ;;  %v1984_v12 = vpop.f32.mrb[28].mxu0  ;;  %v2016_v13 = vpop.f32.mrb[28].mxu1 }
 0x12e   :  { %v1202_v14 = vsel %vm1074_vm11, %v1010_v43, %v1138_v53  ;;  %v1760_v15 = vpack.c.bf16 %v1171_v9, %v1170_v59  ;;  %v1203_v16 = vsel %vm1075_vm15, %v1011_v61, %v1139_v6  ;;  %v1014_v17 = vadd.f32 %v2217_v40, %v725_v50  ;;  %v613_v18 = vpop.f32.mrb[29].mxu0  ;;  %v741_v19 = vpop.f32.mrb[29].mxu1 }
 0x12f   :  { %1893 = vst [vmem:[%s2391_s3 + $0xd8] sm:$0xff] %v1845_v8   ;;  %v1840_v20 = vpack.c.bf16 %v1203_v16, %v1202_v14  ;;  %vm1080_vm1 = vcmp.gt.f32.partialorder %v1016_v10, 0.0  ;;  %v1144_v21 = vmul.f32 0.2, %v1016_v10  ;;  %vm1046_vm2 = vcmp.gt.f32.partialorder %v982_v11, 0.0  ;;  %v1985_v22 = vpop.f32.mrb[30].mxu0 }
 0x130   :  { %v2017_v23 = vpop.f32.mrb[30].mxu1  ;;  %1876 = vst [vmem:[%s2391_s3 + $0x50] sm:$0xff] %v1760_v15   ;;  %v1176_v24 = vsel %vm1048_vm0, %v984_v2, %v1112_v7  ;;  %v1110_v25 = vmul.f32 0.2, %v982_v11  ;;  %vm1078_vm3 = vcmp.gt.f32.partialorder %v1014_v17, 0.0  ;;  %v985_v26 = vadd.f32 %v1981_v56, %v2217_v40  ;;  %v616_v27 = vpop.f32.mrb[31].mxu0 }
 0x131   :  { %1892 = vst [vmem:[%s2391_s3 + $0xd0] sm:$0xff] %v1840_v20   ;;  %v1142_v28 = vmul.f32 0.2, %v1014_v17  ;;  %v1017_v29 = vadd.f32 %v2013_v57, %v2217_v40  ;;  %v983_v30 = vadd.f32 %v2217_v40, %v600_v62  ;;  %v1015_v31 = vadd.f32 %v2217_v40, %v728_v63  ;;  %v744_v32 = vpop.f32.mrb[31].mxu1 }
 0x132   :  { %v1208_v33 = vsel %vm1080_vm1, %v1016_v10, %v1144_v21  ;;  %v1174_v34 = vsel %vm1046_vm2, %v982_v11, %v1110_v25  ;;  %vm1049_vm4 = vcmp.gt.f32.partialorder %v985_v26, 0.0  ;;  %v1113_v35 = vmul.f32 0.2, %v985_v26 }
 0x133   :  { %vm1081_vm5 = vcmp.gt.f32.partialorder %v1017_v29, 0.0  ;;  %v1145_v36 = vmul.f32 0.2, %v1017_v29  ;;  %vm1047_vm6 = vcmp.gt.f32.partialorder %v983_v30, 0.0  ;;  %v1111_v37 = vmul.f32 0.2, %v983_v30 }
 0x134   :  { %v1177_v38 = vsel %vm1049_vm4, %v985_v26, %v1113_v35  ;;  %vm1079_vm7 = vcmp.gt.f32.partialorder %v1015_v31, 0.0  ;;  %v1143_v39 = vmul.f32 0.2, %v1015_v31  ;;  %v988_v41 = vadd.f32 %v1984_v12, %v2217_v40 }
 0x135   :  { %v1775_v42 = vpack.c.bf16 %v1177_v38, %v1176_v24  ;;  %v1209_v43 = vsel %vm1081_vm5, %v1017_v29, %v1145_v36  ;;  %v1175_v44 = vsel %vm1047_vm6, %v983_v30, %v1111_v37  ;;  %v1020_v45 = vadd.f32 %v2016_v13, %v2217_v40 }
 0x136   :  { %v1206_v46 = vsel %vm1078_vm3, %v1014_v17, %v1142_v28  ;;  %v1855_v47 = vpack.c.bf16 %v1209_v43, %v1208_v33  ;;  %v1770_v48 = vpack.c.bf16 %v1175_v44, %v1174_v34  ;;  %v1207_v49 = vsel %vm1079_vm7, %v1015_v31, %v1143_v39 }
 0x137   :  { %1879 = vst [vmem:[%s2391_s3 + $0x68] sm:$0xff] %v1775_v42   ;;  %v1850_v50 = vpack.c.bf16 %v1207_v49, %v1206_v46  ;;  %vm1052_vm8 = vcmp.gt.f32.partialorder %v988_v41, 0.0  ;;  %v1116_v51 = vmul.f32 0.2, %v988_v41  ;;  %v1148_v52 = vmul.f32 0.2, %v1020_v45 }
 0x138   :  { %1895 = vst [vmem:[%s2391_s3 + $0xe8] sm:$0xff] %v1855_v47   ;;  %1878 = vst [vmem:[%s2391_s3 + $0x60] sm:$0xff] %v1770_v48   ;;  %v986_v53 = vadd.f32 %v2217_v40, %v613_v18  ;;  %v1018_v54 = vadd.f32 %v2217_v40, %v741_v19  ;;  %v989_v55 = vadd.f32 %v1985_v22, %v2217_v40  ;;  %vm1084_vm9 = vcmp.gt.f32.partialorder %v1020_v45, 0.0 }
 0x139   :  { %v1021_v56 = vadd.f32 %v2017_v23, %v2217_v40  ;;  %1894 = vst [vmem:[%s2391_s3 + $0xe0] sm:$0xff] %v1850_v50   ;;  %v987_v57 = vadd.f32 %v2217_v40, %v616_v27  ;;  %v1019_v58 = vadd.f32 %v2217_v40, %v744_v32  ;;  %v1180_v59 = vsel %vm1052_vm8, %v988_v41, %v1116_v51 }
 0x13a   :  { %vm1050_vm10 = vcmp.gt.f32.partialorder %v986_v53, 0.0  ;;  %v1114_v60 = vmul.f32 0.2, %v986_v53  ;;  %v1146_v61 = vmul.f32 0.2, %v1018_v54  ;;  %vm1053_vm11 = vcmp.gt.f32.partialorder %v989_v55, 0.0 }
 0x13b   :  { %v1117_v62 = vmul.f32 0.2, %v989_v55  ;;  %vm1085_vm12 = vcmp.gt.f32.partialorder %v1021_v56, 0.0  ;;  %v1149_v63 = vmul.f32 0.2, %v1021_v56  ;;  %v1212_v0 = vsel %vm1084_vm9, %v1020_v45, %v1148_v52 }
 0x13c   :  { %vm1082_vm13 = vcmp.gt.f32.partialorder %v1018_v54, 0.0  ;;  %vm1051_vm14 = vcmp.gt.f32.partialorder %v987_v57, 0.0  ;;  %v1115_v1 = vmul.f32 0.2, %v987_v57  ;;  %vm1083_vm15 = vcmp.gt.f32.partialorder %v1019_v58, 0.0 }
 0x13d   :  { %v1181_v2 = vsel %vm1053_vm11, %v989_v55, %v1117_v62  ;;  %v1213_v3 = vsel %vm1085_vm12, %v1021_v56, %v1149_v63  ;;  %v1147_v4 = vmul.f32 0.2, %v1019_v58  ;;  %v1178_v5 = vsel %vm1050_vm10, %v986_v53, %v1114_v60 }
 0x13e   :  { %v1785_v6 = vpack.c.bf16 %v1181_v2, %v1180_v59  ;;  %v1865_v7 = vpack.c.bf16 %v1213_v3, %v1212_v0  ;;  %v1179_v40 = vsel %vm1051_vm14, %v987_v57, %v1115_v1  ;;  %v1210_v8 = vsel %vm1082_vm13, %v1018_v54, %v1146_v61 }
 0x13f   :  { %v1780_v9 = vpack.c.bf16 %v1179_v40, %v1178_v5  ;;  %v1211_v10 = vsel %vm1083_vm15, %v1019_v58, %v1147_v4 }
 0x140   :  { %1881 = vst [vmem:[%s2391_s3 + $0x78] sm:$0xff] %v1785_v6   ;;  %1897 = vst [vmem:[%s2391_s3 + $0xf8] sm:$0xff] %v1865_v7   ;;  %v1860_v11 = vpack.c.bf16 %v1211_v10, %v1210_v8 }
 0x141   :  { %1880 = vst [vmem:[%s2391_s3 + $0x70] sm:$0xff] %v1780_v9  }
 0x142   :  { %1896 = vst [vmem:[%s2391_s3 + $0xf0] sm:$0xff] %v1860_v11  }

// kernel: _lambda_.6
= control target key start
LH: loop header
LB: loop body
LE: loop exit
PB: predicated region body
PF: predicated region fallthrough
CT: control target
= control target key end

     0   :  { %s1024_s1 = inlined_call_operand.vmem [shape: bf16[256,128], index: 1, kind: input, shape index: {}]   ;;  %s1025_s0 = inlined_call_operand.vmem [shape: bf16[128,256], index: 0, kind: input, shape index: {}]   ;;  %s1026_s2 = inlined_call_operand.vmem [shape: f32[1,128], index: 2, kind: input, shape index: {}]   ;;  %s1027_s3 = inlined_call_operand.vmem [shape: bf16[128,128], index: 3, kind: output, shape index: {0}]   ;;  %s1028_s4 = inlined_call_operand.vmem [shape: f32[8,128], index: 4, kind: output, shape index: {1}]  }
   0x1   :  { %v788_v0 = vld [vmem:[%s1024_s1 + $0x40] sm:$0xff]   ;;  %v790_v2 = vld [vmem:[%s1024_s1 + $0x48] sm:$0xff]   ;;  %v792_v4 = vld [vmem:[%s1024_s1 + $0x50] sm:$0xff]  }
   0x2   :  { %v789_v1 = vld [vmem:[%s1024_s1] sm:$0xff]   ;;  %708 = vmatprep.subr.bf16.mxu0 %v788_v0  ;;  %772 = vmatprep.subr.bf16.mxu1 %v788_v0  ;;  %v791_v3 = vld [vmem:[%s1024_s1 + $0x8] sm:$0xff]   ;;  %v793_v5 = vld [vmem:[%s1024_s1 + $0x10] sm:$0xff]  }
   0x3   :  { %709 = vmatpush3.bf16.msra.mxu0 %v789_v1  ;;  %780 = vmatpush3.bf16.msra.mxu1 %v789_v1  ;;  %v794_v6 = vld [vmem:[%s1024_s1 + $0x58] sm:$0xff]   ;;  %v796_v8 = vld [vmem:[%s1024_s1 + $0x60] sm:$0xff]   ;;  %v798_v10 = vld [vmem:[%s1024_s1 + $0x68] sm:$0xff]  }
   0x4   :  { %710 = vmatprep.subr.bf16.mxu0 %v790_v2  ;;  %773 = vmatprep.subr.bf16.mxu1 %v790_v2  ;;  %v795_v7 = vld [vmem:[%s1024_s1 + $0x18] sm:$0xff]   ;;  %v797_v9 = vld [vmem:[%s1024_s1 + $0x20] sm:$0xff]   ;;  %v799_v12 = vld [vmem:[%s1024_s1 + $0x28] sm:$0xff]  }
   0x5   :  { %v806_v11 = vld [vmem:[%s1025_s0 + $0x4] ss:$8 sps:$4 sm:$0xff]   ;;  %v800_v14 = vld [vmem:[%s1024_s1 + $0x70] sm:$0xff]   ;;  %v802_v16 = vld [vmem:[%s1024_s1 + $0x78] sm:$0xff]  }
   0x6   :  { %v812_v13 = vld [vmem:[%s1025_s0 + $0x44] ss:$8 sps:$4 sm:$0xff]   ;;  %309 = vmatprep.mubr.bf16.mxu0 %v806_v11  ;;  %v801_v15 = vld [vmem:[%s1024_s1 + $0x30] sm:$0xff]   ;;  %v803_v17 = vld [vmem:[%s1024_s1 + $0x38] sm:$0xff]  }
   0x7   :  { %711 = vmatpush3.bf16.msra.mxu0 %v791_v3  ;;  %781 = vmatpush3.bf16.msra.mxu1 %v791_v3  ;;  %v804_v18 = vld [vmem:[%s1025_s0] ss:$8 sps:$4 sm:$0xff]   ;;  %v807_v20 = vld [vmem:[%s1025_s0 + $0x14] ss:$8 sps:$4 sm:$0xff]   ;;  %v809_v22 = vld [vmem:[%s1025_s0 + $0x10] ss:$8 sps:$4 sm:$0xff]  }
   0x8   :  { %712 = vmatprep.subr.bf16.mxu0 %v792_v4  ;;  %774 = vmatprep.subr.bf16.mxu1 %v792_v4  ;;  %v810_v19 = vld [vmem:[%s1025_s0 + $0x40] ss:$8 sps:$4 sm:$0xff]   ;;  %v816_v21 = vld [vmem:[%s1025_s0 + $0x54] ss:$8 sps:$4 sm:$0xff]   ;;  %v818_v23 = vld [vmem:[%s1025_s0 + $0x50] ss:$8 sps:$4 sm:$0xff]  }
   0x9   :  { %341 = vmatprep.mubr.bf16.mxu1 %v812_v13  ;;  %v813_v24 = vld [vmem:[%s1025_s0 + $0x24] ss:$8 sps:$4 sm:$0xff]   ;;  %v815_v26 = vld [vmem:[%s1025_s0 + $0x20] ss:$8 sps:$4 sm:$0xff]   ;;  %v819_v28 = vld [vmem:[%s1025_s0 + $0x34] ss:$8 sps:$4 sm:$0xff]  }
   0xa   :  { %v822_v25 = vld [vmem:[%s1025_s0 + $0x64] ss:$8 sps:$4 sm:$0xff]   ;;  %v824_v27 = vld [vmem:[%s1025_s0 + $0x60] ss:$8 sps:$4 sm:$0xff]   ;;  %v825_v29 = vld [vmem:[%s1025_s0 + $0x74] ss:$8 sps:$4 sm:$0xff]  }
   0xb   :  { %713 = vmatpush3.bf16.msra.mxu0 %v793_v5  ;;  %782 = vmatpush3.bf16.msra.mxu1 %v793_v5  ;;  %v821_v30 = vld [vmem:[%s1025_s0 + $0x30] ss:$8 sps:$4 sm:$0xff]   ;;  %v952_v35 = vld [vmem:[%s1026_s2] ss:$0 sm:$0xff] }
   0xc   :  { %714 = vmatprep.subr.bf16.mxu0 %v794_v6  ;;  %775 = vmatprep.subr.bf16.mxu1 %v794_v6  ;;  %v827_v31 = vld [vmem:[%s1025_s0 + $0x70] ss:$8 sps:$4 sm:$0xff]  }
   0xf   :  { %715 = vmatpush3.bf16.msra.mxu0 %v795_v7  ;;  %783 = vmatpush3.bf16.msra.mxu1 %v795_v7 }
  0x10   :  { %716 = vmatprep.subr.bf16.mxu0 %v796_v8  ;;  %776 = vmatprep.subr.bf16.mxu1 %v796_v8 }
  0x13   :  { %717 = vmatpush3.bf16.msra.mxu0 %v797_v9  ;;  %784 = vmatpush3.bf16.msra.mxu1 %v797_v9 }
  0x14   :  { %718 = vmatprep.subr.bf16.mxu0 %v798_v10  ;;  %777 = vmatprep.subr.bf16.mxu1 %v798_v10 }
  0x17   :  { %719 = vmatpush3.bf16.msra.mxu0 %v799_v12  ;;  %785 = vmatpush3.bf16.msra.mxu1 %v799_v12 }
  0x18   :  { %720 = vmatprep.subr.bf16.mxu0 %v800_v14  ;;  %778 = vmatprep.subr.bf16.mxu1 %v800_v14 }
  0x1b   :  { %721 = vmatpush3.bf16.msra.mxu0 %v801_v15  ;;  %786 = vmatpush3.bf16.msra.mxu1 %v801_v15 }
  0x1c   :  { %722 = vmatprep.subr.bf16.mxu0 %v802_v16  ;;  %779 = vmatprep.subr.bf16.mxu1 %v802_v16 }
  0x1f   :  { %723 = vmatpush3.bf16.msra.mxu0 %v803_v17  ;;  %787 = vmatpush3.bf16.msra.mxu1 %v803_v17 }
  0x22   :  { %310 = vmatmul.mubr.bf16.vlgmr.msra.gmra.mrb[0].mxu0 %v804_v18  ;;  %342 = vmatmul.mubr.bf16.vlgmr.msra.gmra.mrb[0].mxu1 %v810_v19 }
  0x23   :  { %317 = vmatprep.mubr.bf16.mxu0 %v807_v20  ;;  %349 = vmatprep.mubr.bf16.mxu1 %v816_v21 }
  0x2a   :  { %318 = vmatmul.mubr.bf16.gmra.mrb[4].mxu0 %v809_v22  ;;  %350 = vmatmul.mubr.bf16.gmra.mrb[4].mxu1 %v818_v23 }
  0x2b   :  { %325 = vmatprep.mubr.bf16.mxu0 %v813_v24  ;;  %357 = vmatprep.mubr.bf16.mxu1 %v822_v25 }
  0x32   :  { %326 = vmatmul.mubr.bf16.gmra.mrb[8].mxu0 %v815_v26  ;;  %358 = vmatmul.mubr.bf16.gmra.mrb[8].mxu1 %v824_v27 }
  0x33   :  { %333 = vmatprep.mubr.bf16.mxu0 %v819_v28  ;;  %365 = vmatprep.mubr.bf16.mxu1 %v825_v29 }
  0x3a   :  { %334 = vmatmul.mubr.bf16.gmra.mrb[12].mxu0 %v821_v30  ;;  %366 = vmatmul.mubr.bf16.gmra.mrb[12].mxu1 %v827_v31 }
  0xf5   :  { %v724_v32 = vpop.f32.mrb[0].mxu0  ;;  %v748_v33 = vpop.f32.mrb[0].mxu1 }
  0xf6   :  { %v725_v34 = vpop.f32.mrb[1].mxu0  ;;  %v749_v36 = vpop.f32.mrb[1].mxu1 }
  0xf7   :  { %v726_v37 = vadd.f32 %v725_v34, %v724_v32  ;;  %v727_v38 = vpop.f32.mrb[2].mxu0  ;;  %v750_v39 = vadd.f32 %v749_v36, %v748_v33  ;;  %v751_v40 = vpop.f32.mrb[2].mxu1 }
  0xf8   :  { %v728_v41 = vpop.f32.mrb[3].mxu0  ;;  %v752_v42 = vpop.f32.mrb[3].mxu1 }
  0xf9   :  { %v432_v43 = vadd.f32 %v726_v37, %v952_v35  ;;  %v729_v44 = vadd.f32 %v728_v41, %v727_v38  ;;  %v956_v45 = vadd.f32 %v750_v39, %v952_v35  ;;  %v753_v46 = vadd.f32 %v752_v42, %v751_v40 }
  0xfb   :  { %v433_v47 = vadd.f32 %v729_v44, %v952_v35  ;;  %v960_v48 = vadd.f32 %v753_v46, %v952_v35  ;;  %v550_v49 = vmul.f32 %v432_v43, %v432_v43 }
  0xfd   :  { %v664_v50 = vpack.c.bf16 %v433_v47, %v432_v43  ;;  %v528_v51 = vadd.f32 %v433_v47, %v432_v43  ;;  %v551_v52 = vmul.f32 %v433_v47, %v433_v47  ;;  %v730_v53 = vpop.f32.mrb[4].mxu0  ;;  %v684_v54 = vpack.c.bf16 %v960_v48, %v956_v45  ;;  %v754_v55 = vpop.f32.mrb[4].mxu1 }
  0xfe   :  { %v731_v56 = vpop.f32.mrb[5].mxu0  ;;  %v755_v57 = vpop.f32.mrb[5].mxu1 }
  0xff   :  { %665 = vst [vmem:[%s1027_s3] sm:$0xff] %v664_v50   ;;  %v566_v58 = vadd.f32 %v551_v52, %v550_v49  ;;  %v732_v59 = vadd.f32 %v731_v56, %v730_v53  ;;  %v733_v60 = vpop.f32.mrb[6].mxu0  ;;  %704 = vst [vmem:[%s1027_s3 + $0x20] sm:$0xff] %v684_v54   ;;  %v756_v61 = vadd.f32 %v755_v57, %v754_v55  ;;  %v757_v62 = vpop.f32.mrb[6].mxu1 }
 0x100   :  { %v734_v63 = vpop.f32.mrb[7].mxu0  ;;  %v758_v0 = vpop.f32.mrb[7].mxu1 }
 0x101   :  { %v434_v1 = vadd.f32 %v732_v59, %v952_v35  ;;  %v735_v2 = vadd.f32 %v734_v63, %v733_v60  ;;  %v759_v3 = vadd.f32 %v758_v0, %v757_v62  ;;  %v972_v4 = vadd.f32 %v756_v61, %v952_v35 }
 0x103   :  { %v529_v5 = vadd.f32 %v528_v51, %v434_v1  ;;  %v552_v6 = vmul.f32 %v434_v1, %v434_v1  ;;  %v435_v7 = vadd.f32 %v735_v2, %v952_v35  ;;  %v976_v8 = vadd.f32 %v759_v3, %v952_v35 }
 0x105   :  { %v567_v9 = vadd.f32 %v566_v58, %v552_v6  ;;  %v669_v10 = vpack.c.bf16 %v435_v7, %v434_v1  ;;  %v530_v11 = vadd.f32 %v529_v5, %v435_v7  ;;  %v553_v12 = vmul.f32 %v435_v7, %v435_v7  ;;  %v736_v13 = vpop.f32.mrb[8].mxu0  ;;  %v760_v14 = vpop.f32.mrb[8].mxu1 }
 0x106   :  { %v737_v15 = vpop.f32.mrb[9].mxu0  ;;  %v689_v16 = vpack.c.bf16 %v976_v8, %v972_v4  ;;  %v761_v17 = vpop.f32.mrb[9].mxu1  ;;  %v558_v1 = vmul.f32 %v956_v45, %v956_v45  ;;  %v560_v7 = vmul.f32 %v972_v4, %v972_v4 }
 0x107   :  { %701 = vst [vmem:[%s1027_s3 + $0x8] sm:$0xff] %v669_v10   ;;  %v568_v18 = vadd.f32 %v567_v9, %v553_v12  ;;  %v738_v19 = vadd.f32 %v737_v15, %v736_v13  ;;  %v739_v20 = vpop.f32.mrb[10].mxu0  ;;  %v762_v21 = vadd.f32 %v761_v17, %v760_v14  ;;  %v763_v22 = vpop.f32.mrb[10].mxu1 }
 0x108   :  { %v740_v23 = vpop.f32.mrb[11].mxu0  ;;  %705 = vst [vmem:[%s1027_s3 + $0x28] sm:$0xff] %v689_v16   ;;  %v764_v24 = vpop.f32.mrb[11].mxu1 }
 0x109   :  { %v436_v25 = vadd.f32 %v738_v19, %v952_v35  ;;  %v741_v26 = vadd.f32 %v740_v23, %v739_v20  ;;  %v765_v27 = vadd.f32 %v764_v24, %v763_v22  ;;  %v444_v28 = vadd.f32 %v762_v21, %v952_v35 }
 0x10b   :  { %v531_v29 = vadd.f32 %v530_v11, %v436_v25  ;;  %v554_v30 = vmul.f32 %v436_v25, %v436_v25  ;;  %v437_v31 = vadd.f32 %v741_v26, %v952_v35  ;;  %v445_v32 = vadd.f32 %v765_v27, %v952_v35 }
 0x10c   :  { %v562_v14 = vmul.f32 %v444_v28, %v444_v28 }
 0x10d   :  { %v569_v33 = vadd.f32 %v568_v18, %v554_v30  ;;  %v674_v34 = vpack.c.bf16 %v437_v31, %v436_v25  ;;  %v532_v36 = vadd.f32 %v531_v29, %v437_v31  ;;  %v555_v37 = vmul.f32 %v437_v31, %v437_v31  ;;  %v742_v38 = vpop.f32.mrb[12].mxu0  ;;  %v766_v39 = vpop.f32.mrb[12].mxu1 }
 0x10e   :  { %v743_v40 = vpop.f32.mrb[13].mxu0  ;;  %v694_v41 = vpack.c.bf16 %v445_v32, %v444_v28  ;;  %v767_v42 = vpop.f32.mrb[13].mxu1  ;;  %v563_v18 = vmul.f32 %v445_v32, %v445_v32 }
 0x10f   :  { %702 = vst [vmem:[%s1027_s3 + $0x10] sm:$0xff] %v674_v34   ;;  %v570_v43 = vadd.f32 %v569_v33, %v555_v37  ;;  %v744_v44 = vadd.f32 %v743_v40, %v742_v38  ;;  %v745_v46 = vpop.f32.mrb[14].mxu0  ;;  %v768_v47 = vadd.f32 %v767_v42, %v766_v39  ;;  %v769_v49 = vpop.f32.mrb[14].mxu1 }
 0x110   :  { %v746_v50 = vpop.f32.mrb[15].mxu0  ;;  %706 = vst [vmem:[%s1027_s3 + $0x30] sm:$0xff] %v694_v41   ;;  %v770_v51 = vpop.f32.mrb[15].mxu1 }
 0x111   :  { %v438_v52 = vadd.f32 %v744_v44, %v952_v35  ;;  %v747_v53 = vadd.f32 %v746_v50, %v745_v46  ;;  %v771_v54 = vadd.f32 %v770_v51, %v769_v49  ;;  %v446_v55 = vadd.f32 %v768_v47, %v952_v35 }
 0x113   :  { %v533_v56 = vadd.f32 %v532_v36, %v438_v52  ;;  %v556_v57 = vmul.f32 %v438_v52, %v438_v52  ;;  %v439_v58 = vadd.f32 %v747_v53, %v952_v35  ;;  %v447_v59 = vadd.f32 %v771_v54, %v952_v35 }
 0x114   :  { %v559_v35 = vmul.f32 %v960_v48, %v960_v48 }
 0x115   :  { %v571_v60 = vadd.f32 %v570_v43, %v556_v57  ;;  %v679_v61 = vpack.c.bf16 %v439_v58, %v438_v52  ;;  %v534_v62 = vadd.f32 %v533_v56, %v439_v58  ;;  %v557_v63 = vmul.f32 %v439_v58, %v439_v58 }
 0x116   :  { %v699_v0 = vpack.c.bf16 %v447_v59, %v446_v55  ;;  %v565_v23 = vmul.f32 %v447_v59, %v447_v59 }
 0x117   :  { %703 = vst [vmem:[%s1027_s3 + $0x18] sm:$0xff] %v679_v61   ;;  %v535_v2 = vadd.f32 %v534_v62, %v956_v45  ;;  %v572_v3 = vadd.f32 %v571_v60, %v557_v63  ;;  %v561_v45 = vmul.f32 %v976_v8, %v976_v8 }
 0x118   :  { %707 = vst [vmem:[%s1027_s3 + $0x38] sm:$0xff] %v699_v0  }
 0x119   :  { %v536_v5 = vadd.f32 %v535_v2, %v960_v48  ;;  %v573_v6 = vadd.f32 %v572_v3, %v558_v1  ;;  %v564_v48 = vmul.f32 %v446_v55, %v446_v55 }
 0x11b   :  { %v574_v9 = vadd.f32 %v573_v6, %v559_v35  ;;  %v537_v10 = vadd.f32 %v536_v5, %v972_v4 }
 0x11d   :  { %v538_v11 = vadd.f32 %v537_v10, %v976_v8  ;;  %v575_v12 = vadd.f32 %v574_v9, %v560_v7 }
 0x11f   :  { %v539_v13 = vadd.f32 %v538_v11, %v444_v28  ;;  %v576_v15 = vadd.f32 %v575_v12, %v561_v45 }
 0x121   :  { %v577_v16 = vadd.f32 %v576_v15, %v562_v14  ;;  %v540_v17 = vadd.f32 %v539_v13, %v445_v32 }
 0x123   :  { %v578_v19 = vadd.f32 %v577_v16, %v563_v18  ;;  %v541_v20 = vadd.f32 %v540_v17, %v446_v55 }
 0x125   :  { %v579_v21 = vadd.f32 %v578_v19, %v564_v48  ;;  %v542_v22 = vadd.f32 %v541_v20, %v447_v59 }
 0x127   :  { %v543_v24 = vrot.slane %v542_v22, 4  ;;  %v580_v4 = vadd.f32 %v579_v21, %v565_v23 }
 0x129   :  { %v544_v25 = vadd.f32 %v543_v24, %v542_v22  ;;  %v581_v26 = vrot.slane %v580_v4, 4 }
 0x12b   :  { %v545_v27 = vrot.slane %v544_v25, 2  ;;  %v582_v29 = vadd.f32 %v581_v26, %v580_v4 }
 0x12d   :  { %v546_v8 = vadd.f32 %v545_v27, %v544_v25  ;;  %v583_v30 = vrot.slane %v582_v29, 2 }
 0x12f   :  { %v547_v31 = vrot.slane %v546_v8, 1  ;;  %v584_v28 = vadd.f32 %v583_v30, %v582_v29 }
 0x131   :  { %v548_v33 = vadd.f32 %v547_v31, %v546_v8  ;;  %v585_v34 = vrot.slane %v584_v28, 1 }
 0x133   :  { %549 = vst [vmem:[%s1028_s4] sm:$0x1] %v548_v33  ;;  %v586_v32 = vadd.f32 %v585_v34, %v584_v28 }
 0x135   :  { %587 = vst [vmem:[%s1028_s4 + $0x1] sm:$0x1] %v586_v32 }

// kernel: _lambda_.7
= control target key start
LH: loop header
LB: loop body
LE: loop exit
PB: predicated region body
PF: predicated region fallthrough
CT: control target
= control target key end

     0   :  { %s829_s1 = inlined_call_operand.vmem [shape: bf16[512,128], index: 1, kind: input, shape index: {}]   ;;  %s830_s0 = inlined_call_operand.vmem [shape: bf16[32,512], index: 0, kind: input, shape index: {}]   ;;  %s831_s2 = inlined_call_operand.vmem [shape: f32[1,128], index: 2, kind: input, shape index: {}]   ;;  %s832_s3 = inlined_call_operand.vmem [shape: bf16[32,128], index: 3, kind: output, shape index: {0}]   ;;  %s833_s4 = inlined_call_operand.vmem [shape: f32[8,128], index: 4, kind: output, shape index: {1}]  }
   0x1   :  { %v625_v0 = vld [vmem:[%s829_s1 + $0x40] sm:$0xff]   ;;  %v629_v4 = vld [vmem:[%s829_s1 + $0x48] sm:$0xff]   ;;  %v633_v8 = vld [vmem:[%s829_s1 + $0x50] sm:$0xff]  }
   0x2   :  { %v626_v1 = vld [vmem:[%s829_s1 + $0xc0] sm:$0xff]   ;;  %569 = vmatprep.subr.bf16.mxu0 %v625_v0  ;;  %v630_v5 = vld [vmem:[%s829_s1 + $0xc8] sm:$0xff]   ;;  %v634_v9 = vld [vmem:[%s829_s1 + $0xd0] sm:$0xff]  }
   0x3   :  { %v627_v2 = vld [vmem:[%s829_s1] sm:$0xff]   ;;  %597 = vmatprep.subr.bf16.mxu1 %v626_v1  ;;  %v631_v6 = vld [vmem:[%s829_s1 + $0x8] sm:$0xff]   ;;  %v635_v10 = vld [vmem:[%s829_s1 + $0x10] sm:$0xff]  }
   0x4   :  { %v628_v3 = vld [vmem:[%s829_s1 + $0x80] sm:$0xff]   ;;  %570 = vmatpush3.bf16.msra.mxu0 %v627_v2  ;;  %v632_v7 = vld [vmem:[%s829_s1 + $0x88] sm:$0xff]   ;;  %v636_v11 = vld [vmem:[%s829_s1 + $0x90] sm:$0xff]  }
   0x5   :  { %598 = vmatpush3.bf16.msra.mxu1 %v628_v3  ;;  %571 = vmatprep.subr.bf16.mxu0 %v629_v4  ;;  %v637_v12 = vld [vmem:[%s829_s1 + $0x58] sm:$0xff]   ;;  %v641_v16 = vld [vmem:[%s829_s1 + $0x60] sm:$0xff]   ;;  %v645_v20 = vld [vmem:[%s829_s1 + $0x68] sm:$0xff]  }
   0x6   :  { %599 = vmatprep.subr.bf16.mxu1 %v630_v5  ;;  %v638_v13 = vld [vmem:[%s829_s1 + $0xd8] sm:$0xff]   ;;  %v642_v17 = vld [vmem:[%s829_s1 + $0xe0] sm:$0xff]   ;;  %v646_v21 = vld [vmem:[%s829_s1 + $0xe8] sm:$0xff]  }
   0x7   :  { %v639_v14 = vld [vmem:[%s829_s1 + $0x18] sm:$0xff]   ;;  %v643_v18 = vld [vmem:[%s829_s1 + $0x20] sm:$0xff]   ;;  %v647_v22 = vld [vmem:[%s829_s1 + $0x28] sm:$0xff]  }
   0x8   :  { %572 = vmatpush3.bf16.msra.mxu0 %v631_v6  ;;  %v640_v15 = vld [vmem:[%s829_s1 + $0x98] sm:$0xff]   ;;  %v644_v19 = vld [vmem:[%s829_s1 + $0xa0] sm:$0xff]   ;;  %v648_v23 = vld [vmem:[%s829_s1 + $0xa8] sm:$0xff]  }
   0x9   :  { %600 = vmatpush3.bf16.msra.mxu1 %v632_v7  ;;  %573 = vmatprep.subr.bf16.mxu0 %v633_v8  ;;  %v649_v24 = vld [vmem:[%s829_s1 + $0x70] sm:$0xff]   ;;  %v653_v28 = vld [vmem:[%s829_s1 + $0x78] sm:$0xff]   ;;  %v549_v49 = vld [vmem:[%s831_s2] ss:$0 sm:$0xff] }
   0xa   :  { %601 = vmatprep.subr.bf16.mxu1 %v634_v9  ;;  %v650_v25 = vld [vmem:[%s829_s1 + $0xf0] sm:$0xff]   ;;  %v654_v29 = vld [vmem:[%s829_s1 + $0xf8] sm:$0xff]  }
   0xb   :  { %v651_v26 = vld [vmem:[%s829_s1 + $0x30] sm:$0xff]   ;;  %v655_v30 = vld [vmem:[%s829_s1 + $0x38] sm:$0xff]  }
   0xc   :  { %574 = vmatpush3.bf16.msra.mxu0 %v635_v10  ;;  %v652_v27 = vld [vmem:[%s829_s1 + $0xb0] sm:$0xff]   ;;  %v656_v31 = vld [vmem:[%s829_s1 + $0xb8] sm:$0xff]  }
   0xd   :  { %602 = vmatpush3.bf16.msra.mxu1 %v636_v11  ;;  %575 = vmatprep.subr.bf16.mxu0 %v637_v12  ;;  %v657_v32 = vld [vmem:[%s830_s0] ss:$16 sps:$4 sm:$0xff]   ;;  %v659_v33 = vld [vmem:[%s830_s0 + $0x4] ss:$16 sps:$4 sm:$0xff]   ;;  %v660_v34 = vld [vmem:[%s830_s0 + $0x8] ss:$16 sps:$4 sm:$0xff]  }
   0xe   :  { %603 = vmatprep.subr.bf16.mxu1 %v638_v13  ;;  %v662_v35 = vld [vmem:[%s830_s0 + $0xc] ss:$16 sps:$4 sm:$0xff]   ;;  %365 = vmatprep.mubr.bf16.mxu0 %v659_v33  ;;  %v663_v36 = vld [vmem:[%s830_s0 + $0x24] ss:$16 sps:$4 sm:$0xff]   ;;  %v667_v38 = vld [vmem:[%s830_s0 + $0x20] ss:$16 sps:$4 sm:$0xff]  }
   0xf   :  { %414 = vmatprep.mubr.bf16.mxu1 %v662_v35  ;;  %v665_v37 = vld [vmem:[%s830_s0 + $0x2c] ss:$16 sps:$4 sm:$0xff]   ;;  %v668_v39 = vld [vmem:[%s830_s0 + $0x28] ss:$16 sps:$4 sm:$0xff]  }
  0x10   :  { %576 = vmatpush3.bf16.msra.mxu0 %v639_v14 }
  0x11   :  { %604 = vmatpush3.bf16.msra.mxu1 %v640_v15  ;;  %577 = vmatprep.subr.bf16.mxu0 %v641_v16 }
  0x12   :  { %605 = vmatprep.subr.bf16.mxu1 %v642_v17 }
  0x14   :  { %578 = vmatpush3.bf16.msra.mxu0 %v643_v18 }
  0x15   :  { %606 = vmatpush3.bf16.msra.mxu1 %v644_v19  ;;  %579 = vmatprep.subr.bf16.mxu0 %v645_v20 }
  0x16   :  { %607 = vmatprep.subr.bf16.mxu1 %v646_v21 }
  0x18   :  { %580 = vmatpush3.bf16.msra.mxu0 %v647_v22 }
  0x19   :  { %608 = vmatpush3.bf16.msra.mxu1 %v648_v23  ;;  %581 = vmatprep.subr.bf16.mxu0 %v649_v24 }
  0x1a   :  { %609 = vmatprep.subr.bf16.mxu1 %v650_v25 }
  0x1c   :  { %582 = vmatpush3.bf16.msra.mxu0 %v651_v26 }
  0x1d   :  { %610 = vmatpush3.bf16.msra.mxu1 %v652_v27  ;;  %583 = vmatprep.subr.bf16.mxu0 %v653_v28 }
  0x1e   :  { %611 = vmatprep.subr.bf16.mxu1 %v654_v29 }
  0x20   :  { %584 = vmatpush3.bf16.msra.mxu0 %v655_v30 }
  0x21   :  { %612 = vmatpush3.bf16.msra.mxu1 %v656_v31 }
  0x23   :  { %366 = vmatmul.mubr.bf16.vlgmr.msra.gmra.mrb[0].mxu0 %v657_v32 }
  0x24   :  { %415 = vmatmul.mubr.bf16.vlgmr.msra.gmra.mrb[0].mxu1 %v660_v34  ;;  %373 = vmatprep.mubr.bf16.mxu0 %v663_v36 }
  0x25   :  { %422 = vmatprep.mubr.bf16.mxu1 %v665_v37 }
  0x2b   :  { %374 = vmatmul.mubr.bf16.gmra.mrb[4].mxu0 %v667_v38 }
  0x2c   :  { %423 = vmatmul.mubr.bf16.gmra.mrb[4].mxu1 %v668_v39 }
  0xf6   :  { %v585_v40 = vpop.f32.mrb[0].mxu0 }
  0xf7   :  { %v613_v41 = vpop.f32.mrb[0].mxu1  ;;  %v586_v42 = vpop.f32.mrb[1].mxu0 }
  0xf8   :  { %v587_v43 = vadd.f32 %v586_v42, %v585_v40  ;;  %v614_v44 = vpop.f32.mrb[1].mxu1  ;;  %v588_v45 = vpop.f32.mrb[2].mxu0 }
  0xf9   :  { %v615_v46 = vadd.f32 %v614_v44, %v613_v41  ;;  %v616_v47 = vpop.f32.mrb[2].mxu1  ;;  %v589_v48 = vpop.f32.mrb[3].mxu0 }
  0xfa   :  { %v590_v50 = vadd.f32 %v589_v48, %v588_v45  ;;  %v617_v51 = vpop.f32.mrb[3].mxu1 }
  0xfb   :  { %v417_v52 = vadd.f32 %v615_v46, %v587_v43  ;;  %v618_v53 = vadd.f32 %v617_v51, %v616_v47 }
  0xfd   :  { %v453_v54 = vadd.f32 %v549_v49, %v417_v52  ;;  %v420_v55 = vadd.f32 %v618_v53, %v590_v50 }
  0xfe   :  { %v591_v56 = vpop.f32.mrb[4].mxu0 }
  0xff   :  { %v454_v57 = vadd.f32 %v549_v49, %v420_v55  ;;  %v619_v58 = vpop.f32.mrb[4].mxu1  ;;  %v592_v59 = vpop.f32.mrb[5].mxu0  ;;  %v487_v60 = vmul.f32 %v453_v54, %v453_v54 }
 0x100   :  { %v593_v61 = vadd.f32 %v592_v59, %v591_v56  ;;  %v620_v62 = vpop.f32.mrb[5].mxu1  ;;  %v594_v63 = vpop.f32.mrb[6].mxu0 }
 0x101   :  { %v561_v0 = vpack.c.bf16 %v454_v57, %v453_v54  ;;  %v477_v1 = vadd.f32 %v454_v57, %v453_v54  ;;  %v488_v2 = vmul.f32 %v454_v57, %v454_v57  ;;  %v621_v3 = vadd.f32 %v620_v62, %v619_v58  ;;  %v622_v4 = vpop.f32.mrb[6].mxu1  ;;  %v595_v5 = vpop.f32.mrb[7].mxu0 }
 0x102   :  { %v596_v6 = vadd.f32 %v595_v5, %v594_v63  ;;  %v623_v7 = vpop.f32.mrb[7].mxu1 }
 0x103   :  { %562 = vst [vmem:[%s832_s3] sm:$0xff] %v561_v0   ;;  %v491_v8 = vadd.f32 %v488_v2, %v487_v60  ;;  %v425_v9 = vadd.f32 %v621_v3, %v593_v61  ;;  %v624_v10 = vadd.f32 %v623_v7, %v622_v4 }
 0x105   :  { %v455_v11 = vadd.f32 %v549_v49, %v425_v9  ;;  %v428_v12 = vadd.f32 %v624_v10, %v596_v6 }
 0x107   :  { %v478_v13 = vadd.f32 %v477_v1, %v455_v11  ;;  %v489_v14 = vmul.f32 %v455_v11, %v455_v11  ;;  %v456_v15 = vadd.f32 %v549_v49, %v428_v12 }
 0x109   :  { %v492_v16 = vadd.f32 %v491_v8, %v489_v14  ;;  %v566_v17 = vpack.c.bf16 %v456_v15, %v455_v11  ;;  %v479_v18 = vadd.f32 %v478_v13, %v456_v15  ;;  %v490_v19 = vmul.f32 %v456_v15, %v456_v15 }
 0x10b   :  { %568 = vst [vmem:[%s832_s3 + $0x8] sm:$0xff] %v566_v17   ;;  %v480_v20 = vrot.slane %v479_v18, 4  ;;  %v493_v21 = vadd.f32 %v492_v16, %v490_v19 }
 0x10d   :  { %v481_v22 = vadd.f32 %v480_v20, %v479_v18  ;;  %v494_v23 = vrot.slane %v493_v21, 4 }
 0x10f   :  { %v482_v24 = vrot.slane %v481_v22, 2  ;;  %v495_v25 = vadd.f32 %v494_v23, %v493_v21 }
 0x111   :  { %v483_v26 = vadd.f32 %v482_v24, %v481_v22  ;;  %v496_v27 = vrot.slane %v495_v25, 2 }
 0x113   :  { %v484_v28 = vrot.slane %v483_v26, 1  ;;  %v497_v29 = vadd.f32 %v496_v27, %v495_v25 }
 0x115   :  { %v485_v30 = vadd.f32 %v484_v28, %v483_v26  ;;  %v498_v31 = vrot.slane %v497_v29, 1 }
 0x117   :  { %486 = vst [vmem:[%s833_s4] sm:$0x1] %v485_v30  ;;  %v499_v32 = vadd.f32 %v498_v31, %v497_v29 }
 0x119   :  { %500 = vst [vmem:[%s833_s4 + $0x1] sm:$0x1] %v499_v32 }

// kernel: _lambda_.8
= control target key start
LH: loop header
LB: loop body
LE: loop exit
PB: predicated region body
PF: predicated region fallthrough
CT: control target
= control target key end

     0   :  { %s1467_s1 = inlined_call_operand.vmem [shape: bf16[1024,128], index: 1, kind: input, shape index: {}]   ;;  %s1468_s0 = inlined_call_operand.vmem [shape: bf16[32,1024], index: 0, kind: input, shape index: {}]   ;;  %s1469_s2 = inlined_call_operand.vmem [shape: f32[1,128], index: 2, kind: input, shape index: {}]   ;;  %s1470_s3 = inlined_call_operand.vmem [shape: bf16[32,128], index: 3, kind: output, shape index: {0}]   ;;  %s1471_s4 = inlined_call_operand.vmem [shape: f32[8,128], index: 4, kind: output, shape index: {1}]  }
   0x1   :  { %v1123_v0 = vld [vmem:[%s1467_s1 + $0x40] sm:$0xff]   ;;  %v1127_v4 = vld [vmem:[%s1467_s1 + $0x48] sm:$0xff]   ;;  %v1131_v8 = vld [vmem:[%s1467_s1 + $0x50] sm:$0xff]  }
   0x2   :  { %v1124_v1 = vld [vmem:[%s1467_s1 + $0xc0] sm:$0xff]   ;;  %1011 = vmatprep.subr.bf16.mxu0 %v1123_v0  ;;  %v1128_v5 = vld [vmem:[%s1467_s1 + $0xc8] sm:$0xff]   ;;  %v1132_v9 = vld [vmem:[%s1467_s1 + $0xd0] sm:$0xff]  }
   0x3   :  { %v1125_v2 = vld [vmem:[%s1467_s1] sm:$0xff]   ;;  %1039 = vmatprep.subr.bf16.mxu1 %v1124_v1  ;;  %v1129_v6 = vld [vmem:[%s1467_s1 + $0x8] sm:$0xff]   ;;  %v1133_v10 = vld [vmem:[%s1467_s1 + $0x10] sm:$0xff]  }
   0x4   :  { %v1126_v3 = vld [vmem:[%s1467_s1 + $0x80] sm:$0xff]   ;;  %1012 = vmatpush3.bf16.msra.mxu0 %v1125_v2  ;;  %v1130_v7 = vld [vmem:[%s1467_s1 + $0x88] sm:$0xff]   ;;  %v1134_v11 = vld [vmem:[%s1467_s1 + $0x90] sm:$0xff]  }
   0x5   :  { %1040 = vmatpush3.bf16.msra.mxu1 %v1126_v3  ;;  %1013 = vmatprep.subr.bf16.mxu0 %v1127_v4  ;;  %v1135_v12 = vld [vmem:[%s1467_s1 + $0x58] sm:$0xff]   ;;  %v1139_v16 = vld [vmem:[%s1467_s1 + $0x60] sm:$0xff]   ;;  %v1143_v20 = vld [vmem:[%s1467_s1 + $0x68] sm:$0xff]  }
   0x6   :  { %1041 = vmatprep.subr.bf16.mxu1 %v1128_v5  ;;  %v1136_v13 = vld [vmem:[%s1467_s1 + $0xd8] sm:$0xff]   ;;  %v1140_v17 = vld [vmem:[%s1467_s1 + $0xe0] sm:$0xff]   ;;  %v1144_v21 = vld [vmem:[%s1467_s1 + $0xe8] sm:$0xff]  }
   0x7   :  { %v1137_v14 = vld [vmem:[%s1467_s1 + $0x18] sm:$0xff]   ;;  %v1141_v18 = vld [vmem:[%s1467_s1 + $0x20] sm:$0xff]   ;;  %v1145_v22 = vld [vmem:[%s1467_s1 + $0x28] sm:$0xff]  }
   0x8   :  { %1014 = vmatpush3.bf16.msra.mxu0 %v1129_v6  ;;  %v1138_v15 = vld [vmem:[%s1467_s1 + $0x98] sm:$0xff]   ;;  %v1142_v19 = vld [vmem:[%s1467_s1 + $0xa0] sm:$0xff]   ;;  %v1146_v23 = vld [vmem:[%s1467_s1 + $0xa8] sm:$0xff]  }
   0x9   :  { %1042 = vmatpush3.bf16.msra.mxu1 %v1130_v7  ;;  %1015 = vmatprep.subr.bf16.mxu0 %v1131_v8  ;;  %v1147_v24 = vld [vmem:[%s1467_s1 + $0x70] sm:$0xff]   ;;  %v1151_v28 = vld [vmem:[%s1467_s1 + $0x78] sm:$0xff]   ;;  %v29_v32 = vld [vmem:[%s1468_s0] sm:$0xff] }
   0xa   :  { %1043 = vmatprep.subr.bf16.mxu1 %v1132_v9  ;;  %v1148_v25 = vld [vmem:[%s1467_s1 + $0xf0] sm:$0xff]   ;;  %v1152_v29 = vld [vmem:[%s1467_s1 + $0xf8] sm:$0xff]   ;;  %v33_v33 = vld [vmem:[%s1468_s0 + $0x20] sm:$0xff] }
   0xb   :  { %v1149_v26 = vld [vmem:[%s1467_s1 + $0x30] sm:$0xff]   ;;  %v1153_v30 = vld [vmem:[%s1467_s1 + $0x38] sm:$0xff]   ;;  %v30_v34 = vld [vmem:[%s1468_s0 + $0x8] sm:$0xff]  ;;  %v911_v35 = vcombine.low %v29_v32, %v33_v33  ;;  %v912_v36 = vcombine.high %v29_v32, %v33_v33 }
   0xc   :  { %1016 = vmatpush3.bf16.msra.mxu0 %v1133_v10  ;;  %v1150_v27 = vld [vmem:[%s1467_s1 + $0xb0] sm:$0xff]   ;;  %v1154_v31 = vld [vmem:[%s1467_s1 + $0xb8] sm:$0xff]   ;;  %v34_v37 = vld [vmem:[%s1468_s0 + $0x28] sm:$0xff] }
   0xd   :  { %1044 = vmatpush3.bf16.msra.mxu1 %v1134_v11  ;;  %1017 = vmatprep.subr.bf16.mxu0 %v1135_v12  ;;  %v913_v38 = vcombine.low %v30_v34, %v34_v37  ;;  %v914_v39 = vcombine.high %v30_v34, %v34_v37  ;;  %v1155_v40 = vld [vmem:[%s1467_s1 + $0x140] sm:$0xff]   ;;  %v1159_v44 = vld [vmem:[%s1467_s1 + $0x148] sm:$0xff]   ;;  %v1163_v48 = vld [vmem:[%s1467_s1 + $0x150] sm:$0xff]  }
   0xe   :  { %1045 = vmatprep.subr.bf16.mxu1 %v1136_v13  ;;  %669 = vmatprep.mubr.bf16.mxu0 %v912_v36  ;;  %v1156_v41 = vld [vmem:[%s1467_s1 + $0x1c0] sm:$0xff]   ;;  %v1160_v45 = vld [vmem:[%s1467_s1 + $0x1c8] sm:$0xff]   ;;  %v1164_v49 = vld [vmem:[%s1467_s1 + $0x1d0] sm:$0xff]  }
   0xf   :  { %718 = vmatprep.mubr.bf16.mxu1 %v914_v39  ;;  %v1157_v42 = vld [vmem:[%s1467_s1 + $0x100] sm:$0xff]   ;;  %v1161_v46 = vld [vmem:[%s1467_s1 + $0x108] sm:$0xff]   ;;  %v1165_v50 = vld [vmem:[%s1467_s1 + $0x110] sm:$0xff]  }
  0x10   :  { %1018 = vmatpush3.bf16.msra.mxu0 %v1137_v14  ;;  %v1158_v43 = vld [vmem:[%s1467_s1 + $0x180] sm:$0xff]   ;;  %v1162_v47 = vld [vmem:[%s1467_s1 + $0x188] sm:$0xff]   ;;  %v1166_v51 = vld [vmem:[%s1467_s1 + $0x190] sm:$0xff]  }
  0x11   :  { %1046 = vmatpush3.bf16.msra.mxu1 %v1138_v15  ;;  %1019 = vmatprep.subr.bf16.mxu0 %v1139_v16  ;;  %v1167_v52 = vld [vmem:[%s1467_s1 + $0x158] sm:$0xff]   ;;  %v1171_v56 = vld [vmem:[%s1467_s1 + $0x160] sm:$0xff]   ;;  %v38_v63 = vld [vmem:[%s1468_s0 + $0x48] sm:$0xff] }
  0x12   :  { %1047 = vmatprep.subr.bf16.mxu1 %v1140_v17  ;;  %v1168_v53 = vld [vmem:[%s1467_s1 + $0x1d8] sm:$0xff]   ;;  %v1172_v57 = vld [vmem:[%s1467_s1 + $0x1e0] sm:$0xff]   ;;  %v42_v0 = vld [vmem:[%s1468_s0 + $0x68] sm:$0xff] }
  0x13   :  { %v1169_v54 = vld [vmem:[%s1467_s1 + $0x118] sm:$0xff]   ;;  %v1173_v58 = vld [vmem:[%s1467_s1 + $0x120] sm:$0xff]   ;;  %v922_v2 = vcombine.high %v38_v63, %v42_v0  ;;  %v1175_v3 = vld [vmem:[%s1467_s1 + $0x168] sm:$0xff]   ;;  %v921_v4 = vcombine.low %v38_v63, %v42_v0 }
  0x14   :  { %1020 = vmatpush3.bf16.msra.mxu0 %v1141_v18  ;;  %v1170_v55 = vld [vmem:[%s1467_s1 + $0x198] sm:$0xff]   ;;  %v1174_v59 = vld [vmem:[%s1467_s1 + $0x1a0] sm:$0xff]   ;;  %v1176_v5 = vld [vmem:[%s1467_s1 + $0x1e8] sm:$0xff]  }
  0x15   :  { %1048 = vmatpush3.bf16.msra.mxu1 %v1142_v19  ;;  %1021 = vmatprep.subr.bf16.mxu0 %v1143_v20  ;;  %v37_v60 = vld [vmem:[%s1468_s0 + $0x40] sm:$0xff]  ;;  %v1177_v6 = vld [vmem:[%s1467_s1 + $0x128] sm:$0xff]   ;;  %v1179_v8 = vld [vmem:[%s1467_s1 + $0x170] sm:$0xff]  }
  0x16   :  { %1049 = vmatprep.subr.bf16.mxu1 %v1144_v21  ;;  %v41_v61 = vld [vmem:[%s1468_s0 + $0x60] sm:$0xff]  ;;  %v1178_v7 = vld [vmem:[%s1467_s1 + $0x1a8] sm:$0xff]   ;;  %v1180_v9 = vld [vmem:[%s1467_s1 + $0x1f0] sm:$0xff]  }
  0x17   :  { %v920_v62 = vcombine.high %v37_v60, %v41_v61  ;;  %v919_v1 = vcombine.low %v37_v60, %v41_v61  ;;  %v1181_v10 = vld [vmem:[%s1467_s1 + $0x130] sm:$0xff]   ;;  %v1183_v12 = vld [vmem:[%s1467_s1 + $0x178] sm:$0xff]  }
  0x18   :  { %1022 = vmatpush3.bf16.msra.mxu0 %v1145_v22  ;;  %v1182_v11 = vld [vmem:[%s1467_s1 + $0x1b0] sm:$0xff]   ;;  %v1184_v13 = vld [vmem:[%s1467_s1 + $0x1f8] sm:$0xff]  }
  0x19   :  { %1050 = vmatpush3.bf16.msra.mxu1 %v1146_v23  ;;  %1023 = vmatprep.subr.bf16.mxu0 %v1147_v24  ;;  %v1185_v14 = vld [vmem:[%s1467_s1 + $0x138] sm:$0xff]   ;;  %v31_v16 = vld [vmem:[%s1468_s0 + $0x10] sm:$0xff] }
  0x1a   :  { %1051 = vmatprep.subr.bf16.mxu1 %v1148_v25  ;;  %v1186_v15 = vld [vmem:[%s1467_s1 + $0x1b8] sm:$0xff]   ;;  %v35_v17 = vld [vmem:[%s1468_s0 + $0x30] sm:$0xff] }
  0x1b   :  { %v32_v18 = vld [vmem:[%s1468_s0 + $0x18] sm:$0xff]  ;;  %v915_v20 = vcombine.low %v31_v16, %v35_v17  ;;  %v916_v21 = vcombine.high %v31_v16, %v35_v17  ;;  %v39_v24 = vld [vmem:[%s1468_s0 + $0x50] sm:$0xff] }
  0x1c   :  { %1024 = vmatpush3.bf16.msra.mxu0 %v1149_v26  ;;  %v36_v19 = vld [vmem:[%s1468_s0 + $0x38] sm:$0xff]  ;;  %v43_v25 = vld [vmem:[%s1468_s0 + $0x70] sm:$0xff] }
  0x1d   :  { %1052 = vmatpush3.bf16.msra.mxu1 %v1150_v27  ;;  %1025 = vmatprep.subr.bf16.mxu0 %v1151_v28  ;;  %v917_v22 = vcombine.low %v32_v18, %v36_v19  ;;  %v918_v23 = vcombine.high %v32_v18, %v36_v19  ;;  %v40_v26 = vld [vmem:[%s1468_s0 + $0x58] sm:$0xff]  ;;  %v924_v27 = vcombine.high %v39_v24, %v43_v25 }
  0x1e   :  { %1053 = vmatprep.subr.bf16.mxu1 %v1152_v29  ;;  %v44_v28 = vld [vmem:[%s1468_s0 + $0x78] sm:$0xff] }
  0x1f   :  { %v926_v29 = vcombine.high %v40_v26, %v44_v28 }
  0x20   :  { %1026 = vmatpush3.bf16.msra.mxu0 %v1153_v30  ;;  %v923_v30 = vcombine.low %v39_v24, %v43_v25 }
  0x21   :  { %1054 = vmatpush3.bf16.msra.mxu1 %v1154_v31  ;;  %1067 = vmatprep.subr.bf16.mxu0 %v1155_v40  ;;  %v925_v31 = vcombine.low %v40_v26, %v44_v28 }
  0x22   :  { %1095 = vmatprep.subr.bf16.mxu1 %v1156_v41 }
  0x23   :  { %670 = vmatmul.mubr.bf16.vlgmr.msra.gmra.mrb[0].mxu0 %v911_v35 }
  0x24   :  { %719 = vmatmul.mubr.bf16.vlgmr.msra.gmra.mrb[0].mxu1 %v913_v38  ;;  %1068 = vmatpush3.bf16.msra.mxu0 %v1157_v42 }
  0x25   :  { %1096 = vmatpush3.bf16.msra.mxu1 %v1158_v43  ;;  %1069 = vmatprep.subr.bf16.mxu0 %v1159_v44 }
  0x26   :  { %1097 = vmatprep.subr.bf16.mxu1 %v1160_v45  ;;  %677 = vmatprep.mubr.bf16.mxu0 %v920_v62 }
  0x27   :  { %726 = vmatprep.mubr.bf16.mxu1 %v922_v2 }
  0x28   :  { %1070 = vmatpush3.bf16.msra.mxu0 %v1161_v46 }
  0x29   :  { %1098 = vmatpush3.bf16.msra.mxu1 %v1162_v47  ;;  %1071 = vmatprep.subr.bf16.mxu0 %v1163_v48 }
  0x2a   :  { %1099 = vmatprep.subr.bf16.mxu1 %v1164_v49 }
  0x2b   :  { %678 = vmatmul.mubr.bf16.gmra.mrb[4].mxu0 %v919_v1 }
  0x2c   :  { %1072 = vmatpush3.bf16.msra.mxu0 %v1165_v50  ;;  %727 = vmatmul.mubr.bf16.gmra.mrb[4].mxu1 %v921_v4 }
  0x2d   :  { %1100 = vmatpush3.bf16.msra.mxu1 %v1166_v51  ;;  %1073 = vmatprep.subr.bf16.mxu0 %v1167_v52 }
  0x2e   :  { %1101 = vmatprep.subr.bf16.mxu1 %v1168_v53  ;;  %767 = vmatprep.mubr.bf16.mxu0 %v916_v21 }
  0x2f   :  { %816 = vmatprep.mubr.bf16.mxu1 %v918_v23 }
  0x30   :  { %1074 = vmatpush3.bf16.msra.mxu0 %v1169_v54 }
  0x31   :  { %1102 = vmatpush3.bf16.msra.mxu1 %v1170_v55  ;;  %1075 = vmatprep.subr.bf16.mxu0 %v1171_v56 }
  0x32   :  { %1103 = vmatprep.subr.bf16.mxu1 %v1172_v57 }
  0x34   :  { %1076 = vmatpush3.bf16.msra.mxu0 %v1173_v58 }
  0x35   :  { %1104 = vmatpush3.bf16.msra.mxu1 %v1174_v59  ;;  %1077 = vmatprep.subr.bf16.mxu0 %v1175_v3 }
  0x36   :  { %1105 = vmatprep.subr.bf16.mxu1 %v1176_v5 }
  0x38   :  { %1078 = vmatpush3.bf16.msra.mxu0 %v1177_v6 }
  0x39   :  { %1106 = vmatpush3.bf16.msra.mxu1 %v1178_v7  ;;  %1079 = vmatprep.subr.bf16.mxu0 %v1179_v8 }
  0x3a   :  { %1107 = vmatprep.subr.bf16.mxu1 %v1180_v9  ;;  %v991_v9 = vld [vmem:[%s1469_s2] ss:$0 sm:$0xff] }
  0x3c   :  { %1080 = vmatpush3.bf16.msra.mxu0 %v1181_v10 }
  0x3d   :  { %1108 = vmatpush3.bf16.msra.mxu1 %v1182_v11  ;;  %1081 = vmatprep.subr.bf16.mxu0 %v1183_v12 }
  0x3e   :  { %1109 = vmatprep.subr.bf16.mxu1 %v1184_v13 }
  0x40   :  { %1082 = vmatpush3.bf16.msra.mxu0 %v1185_v14 }
  0x41   :  { %1110 = vmatpush3.bf16.msra.mxu1 %v1186_v15 }
  0x43   :  { %768 = vmatmul.mubr.bf16.vlgmr.msra.gmra.mrb[8].mxu0 %v915_v20 }
  0x44   :  { %817 = vmatmul.mubr.bf16.vlgmr.msra.gmra.mrb[8].mxu1 %v917_v22  ;;  %775 = vmatprep.mubr.bf16.mxu0 %v924_v27 }
  0x45   :  { %824 = vmatprep.mubr.bf16.mxu1 %v926_v29 }
  0x4b   :  { %776 = vmatmul.mubr.bf16.gmra.mrb[12].mxu0 %v923_v30 }
  0x4c   :  { %825 = vmatmul.mubr.bf16.gmra.mrb[12].mxu1 %v925_v31 }
  0xf6   :  { %v1027_v32 = vpop.f32.mrb[0].mxu0 }
  0xf7   :  { %v1055_v33 = vpop.f32.mrb[0].mxu1  ;;  %v1028_v34 = vpop.f32.mrb[1].mxu0 }
  0xf8   :  { %v1029_v35 = vadd.f32 %v1028_v34, %v1027_v32  ;;  %v1056_v36 = vpop.f32.mrb[1].mxu1  ;;  %v1030_v37 = vpop.f32.mrb[2].mxu0 }
  0xf9   :  { %v1057_v38 = vadd.f32 %v1056_v36, %v1055_v33  ;;  %v1058_v39 = vpop.f32.mrb[2].mxu1  ;;  %v1031_v40 = vpop.f32.mrb[3].mxu0 }
  0xfa   :  { %v1032_v41 = vadd.f32 %v1031_v40, %v1030_v37  ;;  %v1059_v42 = vpop.f32.mrb[3].mxu1 }
  0xfb   :  { %v721_v43 = vadd.f32 %v1057_v38, %v1029_v35  ;;  %v1060_v44 = vadd.f32 %v1059_v42, %v1058_v39 }
  0xfd   :  { %v724_v45 = vadd.f32 %v1060_v44, %v1032_v41 }
  0xfe   :  { %v1033_v46 = vpop.f32.mrb[4].mxu0 }
  0xff   :  { %v1061_v47 = vpop.f32.mrb[4].mxu1  ;;  %v1034_v48 = vpop.f32.mrb[5].mxu0 }
 0x100   :  { %v1035_v49 = vadd.f32 %v1034_v48, %v1033_v46  ;;  %v1062_v50 = vpop.f32.mrb[5].mxu1  ;;  %v1036_v51 = vpop.f32.mrb[6].mxu0 }
 0x101   :  { %v1063_v52 = vadd.f32 %v1062_v50, %v1061_v47  ;;  %v1064_v53 = vpop.f32.mrb[6].mxu1  ;;  %v1037_v54 = vpop.f32.mrb[7].mxu0 }
 0x102   :  { %v1038_v55 = vadd.f32 %v1037_v54, %v1036_v51  ;;  %v1065_v56 = vpop.f32.mrb[7].mxu1 }
 0x103   :  { %v729_v57 = vadd.f32 %v1063_v52, %v1035_v49  ;;  %v1066_v58 = vadd.f32 %v1065_v56, %v1064_v53 }
 0x105   :  { %v732_v59 = vadd.f32 %v1066_v58, %v1038_v55 }
 0x116   :  { %v1083_v60 = vpop.f32.mrb[8].mxu0 }
 0x117   :  { %v1111_v61 = vpop.f32.mrb[8].mxu1  ;;  %v1084_v62 = vpop.f32.mrb[9].mxu0 }
 0x118   :  { %v1112_v63 = vpop.f32.mrb[9].mxu1  ;;  %v1085_v0 = vadd.f32 %v1084_v62, %v1083_v60  ;;  %v1086_v2 = vpop.f32.mrb[10].mxu0 }
 0x119   :  { %v1113_v1 = vadd.f32 %v1112_v63, %v1111_v61  ;;  %v1114_v3 = vpop.f32.mrb[10].mxu1  ;;  %v1087_v4 = vpop.f32.mrb[11].mxu0 }
 0x11a   :  { %v1115_v5 = vpop.f32.mrb[11].mxu1  ;;  %v770_v6 = vadd.f32 %v1085_v0, %v721_v43  ;;  %v1088_v7 = vadd.f32 %v1087_v4, %v1086_v2 }
 0x11b   :  { %v1116_v8 = vadd.f32 %v1115_v5, %v1114_v3 }
 0x11c   :  { %v819_v10 = vadd.f32 %v1113_v1, %v770_v6  ;;  %v773_v11 = vadd.f32 %v1088_v7, %v724_v45 }
 0x11e   :  { %v855_v12 = vadd.f32 %v991_v9, %v819_v10  ;;  %v822_v13 = vadd.f32 %v1116_v8, %v773_v11  ;;  %v1089_v14 = vpop.f32.mrb[12].mxu0 }
 0x11f   :  { %v1117_v15 = vpop.f32.mrb[12].mxu1  ;;  %v1090_v16 = vpop.f32.mrb[13].mxu0 }
 0x120   :  { %v1118_v17 = vpop.f32.mrb[13].mxu1  ;;  %v856_v18 = vadd.f32 %v991_v9, %v822_v13  ;;  %v1091_v19 = vadd.f32 %v1090_v16, %v1089_v14  ;;  %v1092_v21 = vpop.f32.mrb[14].mxu0  ;;  %v889_v23 = vmul.f32 %v855_v12, %v855_v12 }
 0x121   :  { %v1119_v20 = vadd.f32 %v1118_v17, %v1117_v15  ;;  %v1120_v22 = vpop.f32.mrb[14].mxu1  ;;  %v1093_v24 = vpop.f32.mrb[15].mxu0 }
 0x122   :  { %v1121_v25 = vpop.f32.mrb[15].mxu1  ;;  %v1003_v26 = vpack.c.bf16 %v856_v18, %v855_v12  ;;  %v879_v27 = vadd.f32 %v856_v18, %v855_v12  ;;  %v890_v28 = vmul.f32 %v856_v18, %v856_v18  ;;  %v778_v29 = vadd.f32 %v1091_v19, %v729_v57 }
 0x123   :  { %v1094_v30 = vadd.f32 %v1093_v24, %v1092_v21  ;;  %v1122_v31 = vadd.f32 %v1121_v25, %v1120_v22 }
 0x124   :  { %1004 = vst [vmem:[%s1470_s3] sm:$0xff] %v1003_v26   ;;  %v893_v32 = vadd.f32 %v890_v28, %v889_v23  ;;  %v827_v33 = vadd.f32 %v1119_v20, %v778_v29 }
 0x125   :  { %v781_v34 = vadd.f32 %v1094_v30, %v732_v59 }
 0x126   :  { %v857_v35 = vadd.f32 %v991_v9, %v827_v33 }
 0x127   :  { %v830_v36 = vadd.f32 %v1122_v31, %v781_v34 }
 0x128   :  { %v880_v37 = vadd.f32 %v879_v27, %v857_v35  ;;  %v891_v38 = vmul.f32 %v857_v35, %v857_v35 }
 0x129   :  { %v858_v39 = vadd.f32 %v991_v9, %v830_v36 }
 0x12a   :  { %v894_v40 = vadd.f32 %v893_v32, %v891_v38 }
 0x12b   :  { %v1008_v41 = vpack.c.bf16 %v858_v39, %v857_v35  ;;  %v881_v42 = vadd.f32 %v880_v37, %v858_v39  ;;  %v892_v43 = vmul.f32 %v858_v39, %v858_v39 }
 0x12d   :  { %1010 = vst [vmem:[%s1470_s3 + $0x8] sm:$0xff] %v1008_v41   ;;  %v882_v44 = vrot.slane %v881_v42, 4  ;;  %v895_v45 = vadd.f32 %v894_v40, %v892_v43 }
 0x12f   :  { %v883_v46 = vadd.f32 %v882_v44, %v881_v42  ;;  %v896_v47 = vrot.slane %v895_v45, 4 }
 0x131   :  { %v884_v48 = vrot.slane %v883_v46, 2  ;;  %v897_v49 = vadd.f32 %v896_v47, %v895_v45 }
 0x133   :  { %v885_v50 = vadd.f32 %v884_v48, %v883_v46  ;;  %v898_v51 = vrot.slane %v897_v49, 2 }
 0x135   :  { %v886_v52 = vrot.slane %v885_v50, 1  ;;  %v899_v53 = vadd.f32 %v898_v51, %v897_v49 }
 0x137   :  { %v887_v54 = vadd.f32 %v886_v52, %v885_v50  ;;  %v900_v55 = vrot.slane %v899_v53, 1 }
 0x139   :  { %888 = vst [vmem:[%s1471_s4] sm:$0x1] %v887_v54  ;;  %v901_v56 = vadd.f32 %v900_v55, %v899_v53 }
 0x13b   :  { %902 = vst [vmem:[%s1471_s4 + $0x1] sm:$0x1] %v901_v56 }

// kernel: _lambda_.9
= control target key start
LH: loop header
LB: loop body
LE: loop exit
PB: predicated region body
PF: predicated region fallthrough
CT: control target
= control target key end

     0   :  { %s1428_s12 = smov 0   ;;  %s1430_s13 = smov 0   ;;  %s1580_s0 = inlined_call_operand.vmem [shape: bf16[16,2048], index: 0, kind: input, shape index: {}]   ;;  %s1581_s1 = inlined_call_operand.vmem [shape: bf16[2048,128], index: 1, kind: input, shape index: {}]   ;;  %s1582_s2 = inlined_call_operand.vmem [shape: f32[1,128], index: 2, kind: input, shape index: {}]   ;;  %s1583_s3 = inlined_call_operand.vmem [shape: f32[16,128], index: 3, kind: output, shape index: {}]  }
   0x1   :  { %s1432_s14 = smov 0   ;;  %s1434_s15 = smov 0  }
   0x2   :  { %s1436_s16 = smov 0  }
   0x3 LB: > { %s22_s17 = sadd.s32 1, %s1401_s15  ;;  %p41_p1 = scmp.ne.s32.totalorder %s1393_s13, %s1389_s12  ;;  %s1405_s16 = sphi %s1436_s16, %s13_s16   ;;  %s1401_s15 = sphi %s1434_s15, %s1587_s15   ;;  %s1397_s14 = sphi %s1432_s14, %s1586_s14   ;;  %s1393_s13 = sphi %s1430_s13, %s1585_s13   ;;  %s1389_s12 = sphi %s1428_s12, %s1584_s12  }
   0x4   : > { %p23_p0 = scmp.ge.s32.totalorder %s22_s17, 2  ;;  %p42_p2 = scmp.eq.s32.totalorder %s1405_s16, 0 }
   0x5   : > { %s34_s19 = sadd.s32 1, %s1393_s13  ;;  %p1086_p5 = scmp.ge.s32.totalorder %s1405_s16, 2 }
   0x6   : > { %s1589_s17 = smov (%p23_p0, %s22_s17), 0  ;;  %p43_p3 = por %p42_p2, %p41_p1 }
   0x7   : > { %s30_s18 = ssub.s32 %s1401_s15, %s1589_s17  ;;  %143 = sbr.rel (%p1086_p5) target bundleno = 22 (0x16), region = 20 }
   0x8   : > { %p32_p4 = scmp.eq.s32.totalorder %s30_s18, 0 }
   0xa   : > { %s1463_s20 = scalar_select %p32_p4, %s1393_s13, %s34_s19  }
   0xe   : > { %146 = sbr.rel (!%p43_p3) target bundleno = 22 (0x16), region = 24  ;;  %s148_s21 = sand.u32 (%p43_p3), 1, %s1393_s13  }
   0xf   : > { %s1173_s22 = sshll.u32 (%p43_p3), %s1401_s15, 5  ;;  %s1087_s23 = sshll.u32 (%p43_p3), %s148_s21, 6 }
  0x10   : > { %s156_s26 = scalar_lea.vmem (%p43_p3), %s1580_s0, %s1173_s22  ;;  %s150_s27 = scalar_lea.vmem (%p43_p3), [#allocation3], %s1087_s23 }
  0x11   : > { %v169_v0 = vld [vmem:[%s156_s26] sm:$0xff] (%p43_p3)  ;;  %v171_v1 = vld [vmem:[%s156_s26 + $0x8] sm:$0xff] (%p43_p3)  ;;  %v173_v2 = vld [vmem:[%s156_s26 + $0x10] sm:$0xff] (%p43_p3) }
  0x12   : > { %170 = vst [vmem:[%s150_s27] sm:$0xff] (%p43_p3), %v169_v0  ;;  %172 = vst [vmem:[%s150_s27 + $0x8] sm:$0xff] (%p43_p3), %v171_v1  ;;  %v175_v3 = vld [vmem:[%s156_s26 + $0x18] sm:$0xff] (%p43_p3)  ;;  %v177_v4 = vld [vmem:[%s156_s26 + $0x40] sm:$0xff] (%p43_p3) }
  0x13   : > { %174 = vst [vmem:[%s150_s27 + $0x10] sm:$0xff] (%p43_p3), %v173_v2  ;;  %v179_v5 = vld [vmem:[%s156_s26 + $0x48] sm:$0xff] (%p43_p3)  ;;  %176 = vst [vmem:[%s150_s27 + $0x18] sm:$0xff] (%p43_p3), %v175_v3  ;;  %v181_v6 = vld [vmem:[%s156_s26 + $0x50] sm:$0xff] (%p43_p3) }
  0x14   : > { %178 = vst [vmem:[%s150_s27 + $0x20] sm:$0xff] (%p43_p3), %v177_v4  ;;  %180 = vst [vmem:[%s150_s27 + $0x28] sm:$0xff] (%p43_p3), %v179_v5  ;;  %v183_v7 = vld [vmem:[%s156_s26 + $0x58] sm:$0xff] (%p43_p3) }
  0x15   : > { %182 = vst [vmem:[%s150_s27 + $0x30] sm:$0xff] %v181_v6  ;;  %184 = vst [vmem:[%s150_s27 + $0x38] sm:$0xff] %v183_v7 }
  0x16 PF: > { %p1090_p6 = scmp.ge.s32.totalorder %s1405_s16, 1  ;;  %p198_p7 = scmp.lt.s32.totalorder %s1405_s16, 3 }
  0x18   : > { %p199_p8 = pnand %p1090_p6, %p198_p7 }
  0x19   : > { %s205_s28 = sand.u32 (!%p199_p8), 1, %s1389_s12   ;;  %s1092_s29 = sshll.u32 (!%p199_p8), %s1397_s14, 7 }
  0x1a   : > { %202 = sbr.rel (%p199_p8) target bundleno = 340 (0x154), region = 51  ;;  %s1091_s30 = sshll.u32 (!%p199_p8), %s205_s28, 6 }
  0x1b   : > { %p236_p9 = scmp.lt.s32.totalorder (!%p199_p8), %s1092_s29, 255  ;;  %s1480_s8 = scalar_lea.vmem (!%p199_p8), [#allocation3], %s1091_s30 }
  0x1c   : > { %p1094_p10 = scmp.ne.s32.totalorder (!%p199_p8), %s1397_s14, 0 }
  0x21   : > { %s1591_s29 = smov (!%p236_p9, %s1092_s29), 255  ;;  %251 = sbr.rel (%p1094_p10) target bundleno = 40 (0x28), region = 59 }
  0x22   : > { %s1093_s4 = sshll.u32 %s1591_s29, 2  ;;  %v1407_v8 = vmov (!%p1094_p10), 0.0  }
  0x23   : > { %s1478_s7 = scalar_lea.vmem %s1581_s1, %s1093_s4  ;;  %252 = vst [vmem:[#allocation2] sm:$0xff] (!%p1094_p10), %v1407_v8  ;;  %253 = vst [vmem:[#allocation2 + $0x8] sm:$0xff] (!%p1094_p10), %v1407_v8 }
  0x28 PF: > { %v1303_v9 = vld [vmem:[%s1478_s7 + $0x40] sm:$0xff]   ;;  %v1307_v13 = vld [vmem:[%s1478_s7 + $0x48] sm:$0xff]   ;;  %v1311_v17 = vld [vmem:[%s1478_s7 + $0x50] sm:$0xff]   ;;  %p1167_p11 = scmp.ne.s32.totalorder %s1397_s14, 1 }
  0x29   : > { %v1304_v10 = vld [vmem:[%s1478_s7 + $0xc0] sm:$0xff]   ;;  %1174 = vmatprep.subr.bf16.mxu0 %v1303_v9  ;;  %v1308_v14 = vld [vmem:[%s1478_s7 + $0xc8] sm:$0xff]   ;;  %v1312_v18 = vld [vmem:[%s1478_s7 + $0xd0] sm:$0xff]  }
  0x2a   : > { %v1305_v11 = vld [vmem:[%s1478_s7] sm:$0xff]   ;;  %1196 = vmatprep.subr.bf16.mxu1 %v1304_v10  ;;  %v1309_v15 = vld [vmem:[%s1478_s7 + $0x8] sm:$0xff]   ;;  %v1313_v19 = vld [vmem:[%s1478_s7 + $0x10] sm:$0xff]  }
  0x2b   : > { %v1306_v12 = vld [vmem:[%s1478_s7 + $0x80] sm:$0xff]   ;;  %1175 = vmatpush3.bf16.msra.mxu0 %v1305_v11  ;;  %v1310_v16 = vld [vmem:[%s1478_s7 + $0x88] sm:$0xff]   ;;  %v1314_v20 = vld [vmem:[%s1478_s7 + $0x90] sm:$0xff]  }
  0x2c   : > { %1197 = vmatpush3.bf16.msra.mxu1 %v1306_v12  ;;  %1176 = vmatprep.subr.bf16.mxu0 %v1307_v13  ;;  %v1315_v21 = vld [vmem:[%s1478_s7 + $0x58] sm:$0xff]   ;;  %v1319_v25 = vld [vmem:[%s1478_s7 + $0x60] sm:$0xff]   ;;  %v1323_v29 = vld [vmem:[%s1478_s7 + $0x68] sm:$0xff]  }
  0x2d   : > { %1198 = vmatprep.subr.bf16.mxu1 %v1308_v14  ;;  %v1316_v22 = vld [vmem:[%s1478_s7 + $0xd8] sm:$0xff]   ;;  %v1320_v26 = vld [vmem:[%s1478_s7 + $0xe0] sm:$0xff]   ;;  %v1324_v30 = vld [vmem:[%s1478_s7 + $0xe8] sm:$0xff]  }
  0x2e   : > { %v1317_v23 = vld [vmem:[%s1478_s7 + $0x18] sm:$0xff]   ;;  %v1321_v27 = vld [vmem:[%s1478_s7 + $0x20] sm:$0xff]   ;;  %v1325_v31 = vld [vmem:[%s1478_s7 + $0x28] sm:$0xff]  }
  0x2f   : > { %1177 = vmatpush3.bf16.msra.mxu0 %v1309_v15  ;;  %v1318_v24 = vld [vmem:[%s1478_s7 + $0x98] sm:$0xff]   ;;  %v1322_v28 = vld [vmem:[%s1478_s7 + $0xa0] sm:$0xff]   ;;  %v1326_v32 = vld [vmem:[%s1478_s7 + $0xa8] sm:$0xff]  }
  0x30   : > { %1199 = vmatpush3.bf16.msra.mxu1 %v1310_v16  ;;  %1178 = vmatprep.subr.bf16.mxu0 %v1311_v17  ;;  %v1327_v33 = vld [vmem:[%s1478_s7 + $0x70] sm:$0xff]   ;;  %v1331_v37 = vld [vmem:[%s1478_s7 + $0x78] sm:$0xff]   ;;  %v1335_v49 = vld [vmem:[%s1478_s7 + $0x140] sm:$0xff]  }
  0x31   : > { %1200 = vmatprep.subr.bf16.mxu1 %v1312_v18  ;;  %v1328_v34 = vld [vmem:[%s1478_s7 + $0xf0] sm:$0xff]   ;;  %v1332_v38 = vld [vmem:[%s1478_s7 + $0xf8] sm:$0xff]   ;;  %v1336_v50 = vld [vmem:[%s1478_s7 + $0x1c0] sm:$0xff]  }
  0x32   : > { %v1329_v35 = vld [vmem:[%s1478_s7 + $0x30] sm:$0xff]   ;;  %v1333_v39 = vld [vmem:[%s1478_s7 + $0x38] sm:$0xff]   ;;  %v1337_v51 = vld [vmem:[%s1478_s7 + $0x100] sm:$0xff]  }
  0x33   : > { %1179 = vmatpush3.bf16.msra.mxu0 %v1313_v19  ;;  %v1330_v36 = vld [vmem:[%s1478_s7 + $0xb0] sm:$0xff]   ;;  %v1334_v40 = vld [vmem:[%s1478_s7 + $0xb8] sm:$0xff]   ;;  %v1338_v52 = vld [vmem:[%s1478_s7 + $0x180] sm:$0xff]  }
  0x34   : > { %1201 = vmatpush3.bf16.msra.mxu1 %v1314_v20  ;;  %1180 = vmatprep.subr.bf16.mxu0 %v1315_v21  ;;  %v256_v41 = vld [vmem:[%s1480_s8] sm:$0xff]  ;;  %v257_v43 = vld [vmem:[%s1480_s8 + $0x8] sm:$0xff]  ;;  %v1339_v53 = vld [vmem:[%s1478_s7 + $0x148] sm:$0xff]  }
  0x35   : > { %1202 = vmatprep.subr.bf16.mxu1 %v1316_v22  ;;  %v260_v42 = vld [vmem:[%s1480_s8 + $0x20] sm:$0xff]  ;;  %v261_v46 = vld [vmem:[%s1480_s8 + $0x28] sm:$0xff]  ;;  %v1340_v54 = vld [vmem:[%s1478_s7 + $0x1c8] sm:$0xff]  }
  0x36   : > { %v1095_v44 = vcombine.low %v256_v41, %v260_v42  ;;  %v1096_v45 = vcombine.high %v256_v41, %v260_v42  ;;  %v1097_v47 = vcombine.low %v257_v43, %v261_v46  ;;  %v1098_v48 = vcombine.high %v257_v43, %v261_v46  ;;  %v1341_v55 = vld [vmem:[%s1478_s7 + $0x108] sm:$0xff]   ;;  %v1343_v57 = vld [vmem:[%s1478_s7 + $0x150] sm:$0xff]   ;;  %v1347_v61 = vld [vmem:[%s1478_s7 + $0x158] sm:$0xff]  }
  0x37   : > { %1181 = vmatpush3.bf16.msra.mxu0 %v1317_v23  ;;  %v1342_v56 = vld [vmem:[%s1478_s7 + $0x188] sm:$0xff]   ;;  %v1344_v58 = vld [vmem:[%s1478_s7 + $0x1d0] sm:$0xff]   ;;  %v1348_v62 = vld [vmem:[%s1478_s7 + $0x1d8] sm:$0xff]  }
  0x38   : > { %1203 = vmatpush3.bf16.msra.mxu1 %v1318_v24  ;;  %1182 = vmatprep.subr.bf16.mxu0 %v1319_v25  ;;  %v1345_v59 = vld [vmem:[%s1478_s7 + $0x110] sm:$0xff]   ;;  %v1349_v63 = vld [vmem:[%s1478_s7 + $0x118] sm:$0xff]   ;;  %v1351_v1 = vld [vmem:[%s1478_s7 + $0x160] sm:$0xff]  }
  0x39   : > { %1204 = vmatprep.subr.bf16.mxu1 %v1320_v26  ;;  %848 = vmatprep.mubr.bf16.mxu0 %v1096_v45  ;;  %v1346_v60 = vld [vmem:[%s1478_s7 + $0x190] sm:$0xff]   ;;  %v1350_v0 = vld [vmem:[%s1478_s7 + $0x198] sm:$0xff]   ;;  %v1352_v2 = vld [vmem:[%s1478_s7 + $0x1e0] sm:$0xff]  }
  0x3a   : > { %889 = vmatprep.mubr.bf16.mxu1 %v1098_v48  ;;  %v1353_v3 = vld [vmem:[%s1478_s7 + $0x120] sm:$0xff]   ;;  %v1355_v5 = vld [vmem:[%s1478_s7 + $0x168] sm:$0xff]   ;;  %v1359_v9 = vld [vmem:[%s1478_s7 + $0x170] sm:$0xff]  }
  0x3b   : > { %1183 = vmatpush3.bf16.msra.mxu0 %v1321_v27  ;;  %v1354_v4 = vld [vmem:[%s1478_s7 + $0x1a0] sm:$0xff]   ;;  %v1356_v6 = vld [vmem:[%s1478_s7 + $0x1e8] sm:$0xff]   ;;  %v1360_v10 = vld [vmem:[%s1478_s7 + $0x1f0] sm:$0xff]  }
  0x3c   : > { %1205 = vmatpush3.bf16.msra.mxu1 %v1322_v28  ;;  %1184 = vmatprep.subr.bf16.mxu0 %v1323_v29  ;;  %v1357_v7 = vld [vmem:[%s1478_s7 + $0x128] sm:$0xff]   ;;  %v1361_v11 = vld [vmem:[%s1478_s7 + $0x130] sm:$0xff]   ;;  %v1363_v13 = vld [vmem:[%s1478_s7 + $0x178] sm:$0xff]  }
  0x3d   : > { %1206 = vmatprep.subr.bf16.mxu1 %v1324_v30  ;;  %v1358_v8 = vld [vmem:[%s1478_s7 + $0x1a8] sm:$0xff]   ;;  %v1362_v12 = vld [vmem:[%s1478_s7 + $0x1b0] sm:$0xff]   ;;  %v1364_v14 = vld [vmem:[%s1478_s7 + $0x1f8] sm:$0xff]  }
  0x3e   : > { %v1365_v15 = vld [vmem:[%s1478_s7 + $0x138] sm:$0xff]   ;;  %v258_v17 = vld [vmem:[%s1480_s8 + $0x10] sm:$0xff]  ;;  %v259_v21 = vld [vmem:[%s1480_s8 + $0x18] sm:$0xff] }
  0x3f   : > { %1185 = vmatpush3.bf16.msra.mxu0 %v1325_v31  ;;  %v1366_v16 = vld [vmem:[%s1478_s7 + $0x1b8] sm:$0xff]   ;;  %v262_v18 = vld [vmem:[%s1480_s8 + $0x30] sm:$0xff]  ;;  %v263_v22 = vld [vmem:[%s1480_s8 + $0x38] sm:$0xff] }
  0x40   : > { %1207 = vmatpush3.bf16.msra.mxu1 %v1326_v32  ;;  %1186 = vmatprep.subr.bf16.mxu0 %v1327_v33  ;;  %v1099_v19 = vcombine.low %v258_v17, %v262_v18  ;;  %v1100_v20 = vcombine.high %v258_v17, %v262_v18  ;;  %v1101_v23 = vcombine.low %v259_v21, %v263_v22 }
  0x41   : > { %1208 = vmatprep.subr.bf16.mxu1 %v1328_v34  ;;  %v1102_v24 = vcombine.high %v259_v21, %v263_v22 }
  0x43   : > { %1187 = vmatpush3.bf16.msra.mxu0 %v1329_v35 }
  0x44   : > { %1209 = vmatpush3.bf16.msra.mxu1 %v1330_v36  ;;  %1188 = vmatprep.subr.bf16.mxu0 %v1331_v37 }
  0x45   : > { %1210 = vmatprep.subr.bf16.mxu1 %v1332_v38 }
  0x47   : > { %1189 = vmatpush3.bf16.msra.mxu0 %v1333_v39 }
  0x48   : > { %1211 = vmatpush3.bf16.msra.mxu1 %v1334_v40  ;;  %1218 = vmatprep.subr.bf16.mxu0 %v1335_v49 }
  0x49   : > { %1240 = vmatprep.subr.bf16.mxu1 %v1336_v50 }
  0x4a   : > { %849 = vmatmul.mubr.bf16.vlgmr.msra.gmra.mrb[0].mxu0 %v1095_v44 }
  0x4b   : > { %890 = vmatmul.mubr.bf16.vlgmr.msra.gmra.mrb[0].mxu1 %v1097_v47  ;;  %1219 = vmatpush3.bf16.msra.mxu0 %v1337_v51  ;;  %v254_v51 = vld [vmem:[#allocation2] sm:$0xff] }
  0x4c   : > { %1241 = vmatpush3.bf16.msra.mxu1 %v1338_v52  ;;  %1220 = vmatprep.subr.bf16.mxu0 %v1339_v53 }
  0x4d   : > { %1242 = vmatprep.subr.bf16.mxu1 %v1340_v54  ;;  %930 = vmatprep.mubr.bf16.mxu0 %v1100_v20 }
  0x4e   : > { %971 = vmatprep.mubr.bf16.mxu1 %v1102_v24 }
  0x4f   : > { %1221 = vmatpush3.bf16.msra.mxu0 %v1341_v55  ;;  %v255_v55 = vld [vmem:[#allocation2 + $0x8] sm:$0xff] }
  0x50   : > { %1243 = vmatpush3.bf16.msra.mxu1 %v1342_v56  ;;  %1222 = vmatprep.subr.bf16.mxu0 %v1343_v57 }
  0x51   : > { %1244 = vmatprep.subr.bf16.mxu1 %v1344_v58 }
  0x53   : > { %1223 = vmatpush3.bf16.msra.mxu0 %v1345_v59 }
  0x54   : > { %1245 = vmatpush3.bf16.msra.mxu1 %v1346_v60  ;;  %1224 = vmatprep.subr.bf16.mxu0 %v1347_v61  ;;  %v1168_v60 = vld [vmem:[%s1582_s2] ss:$0 sm:$0xff] (!%p1167_p11) }
  0x55   : > { %1246 = vmatprep.subr.bf16.mxu1 %v1348_v62 }
  0x57   : > { %1225 = vmatpush3.bf16.msra.mxu0 %v1349_v63 }
  0x58   : > { %1247 = vmatpush3.bf16.msra.mxu1 %v1350_v0  ;;  %1226 = vmatprep.subr.bf16.mxu0 %v1351_v1 }
  0x59   : > { %1248 = vmatprep.subr.bf16.mxu1 %v1352_v2 }
  0x5b   : > { %1227 = vmatpush3.bf16.msra.mxu0 %v1353_v3 }
  0x5c   : > { %1249 = vmatpush3.bf16.msra.mxu1 %v1354_v4  ;;  %1228 = vmatprep.subr.bf16.mxu0 %v1355_v5 }
  0x5d   : > { %1250 = vmatprep.subr.bf16.mxu1 %v1356_v6 }
  0x5f   : > { %1229 = vmatpush3.bf16.msra.mxu0 %v1357_v7 }
  0x60   : > { %1251 = vmatpush3.bf16.msra.mxu1 %v1358_v8  ;;  %1230 = vmatprep.subr.bf16.mxu0 %v1359_v9 }
  0x61   : > { %1252 = vmatprep.subr.bf16.mxu1 %v1360_v10 }
  0x63   : > { %1231 = vmatpush3.bf16.msra.mxu0 %v1361_v11 }
  0x64   : > { %1253 = vmatpush3.bf16.msra.mxu1 %v1362_v12  ;;  %1232 = vmatprep.subr.bf16.mxu0 %v1363_v13 }
  0x65   : > { %1254 = vmatprep.subr.bf16.mxu1 %v1364_v14 }
  0x67   : > { %1233 = vmatpush3.bf16.msra.mxu0 %v1365_v15 }
  0x68   : > { %1255 = vmatpush3.bf16.msra.mxu1 %v1366_v16 }
  0x6a   : > { %931 = vmatmul.mubr.bf16.vlgmr.msra.gmra.mrb[4].mxu0 %v1099_v19 }
  0x6b   : > { %972 = vmatmul.mubr.bf16.vlgmr.msra.gmra.mrb[4].mxu1 %v1101_v23 }
 0x11d   : > { %v1190_v25 = vpop.f32.mrb[0].mxu0 }
 0x11e   : > { %v1212_v26 = vpop.f32.mrb[0].mxu1  ;;  %v1191_v27 = vpop.f32.mrb[1].mxu0 }
 0x11f   : > { %v1192_v28 = vadd.f32 %v1191_v27, %v1190_v25  ;;  %v1213_v29 = vpop.f32.mrb[1].mxu1  ;;  %v1193_v30 = vpop.f32.mrb[2].mxu0 }
 0x120   : > { %v1214_v31 = vadd.f32 %v1213_v29, %v1212_v26  ;;  %v1215_v32 = vpop.f32.mrb[2].mxu1  ;;  %v1194_v33 = vpop.f32.mrb[3].mxu0 }
 0x121   : > { %v1195_v34 = vadd.f32 %v1194_v33, %v1193_v30  ;;  %v1216_v35 = vpop.f32.mrb[3].mxu1 }
 0x122   : > { %v892_v36 = vadd.f32 %v1214_v31, %v1192_v28  ;;  %v1217_v37 = vadd.f32 %v1216_v35, %v1215_v32 }
 0x124   : > { %v895_v38 = vadd.f32 %v1217_v37, %v1195_v34 }
 0x13d   : > { %v1234_v39 = vpop.f32.mrb[4].mxu0 }
 0x13e   : > { %v1256_v40 = vpop.f32.mrb[4].mxu1  ;;  %v1235_v41 = vpop.f32.mrb[5].mxu0 }
 0x13f   : > { %v1236_v42 = vadd.f32 %v1235_v41, %v1234_v39  ;;  %v1257_v43 = vpop.f32.mrb[5].mxu1  ;;  %v1237_v44 = vpop.f32.mrb[6].mxu0 }
 0x140   : > { %v1258_v45 = vadd.f32 %v1257_v43, %v1256_v40  ;;  %v1259_v46 = vpop.f32.mrb[6].mxu1  ;;  %v1238_v47 = vpop.f32.mrb[7].mxu0 }
 0x141   : > { %v933_v48 = vadd.f32 %v1236_v42, %v892_v36  ;;  %v1239_v49 = vadd.f32 %v1238_v47, %v1237_v44  ;;  %v1260_v50 = vpop.f32.mrb[7].mxu1 }
 0x142   : > { %v1261_v52 = vadd.f32 %v1260_v50, %v1259_v46 }
 0x143   : > { %v974_v53 = vadd.f32 %v1258_v45, %v933_v48  ;;  %v936_v54 = vadd.f32 %v1239_v49, %v895_v38  ;;  %987 = sbr.rel (%p1167_p11) target bundleno = 340 (0x154), region = 63 }
 0x145   : > { %v980_v56 = vadd.f32 %v974_v53, %v254_v51  ;;  %v977_v57 = vadd.f32 %v1261_v52, %v936_v54 }
 0x147   : > { %982 = vst [vmem:[#allocation2] sm:$0xff] %v980_v56  ;;  %v981_v58 = vadd.f32 %v977_v57, %v255_v55 }
 0x149   : > { %983 = vst [vmem:[#allocation2 + $0x8] sm:$0xff] %v981_v58 }
 0x14e   : > { %v988_v59 = vld [vmem:[#allocation2] sm:$0xff] }
 0x14f   : > { %v997_v62 = vadd.f32 %v1168_v60, %v988_v59 }
 0x150   : > { %v989_v61 = vld [vmem:[#allocation2 + $0x8] sm:$0xff] }
 0x151   : > { %v998_v63 = vadd.f32 %v1168_v60, %v989_v61  ;;  %999 = vst [vmem:[%s1583_s3] sm:$0xff] %v997_v62 }
 0x153   : > { %1000 = vst [vmem:[%s1583_s3 + $0x8] sm:$0xff] %v998_v63 }
 0x154 PF: > { %s13_s16 = sadd.s32 1, %s1405_s16   ;;  %s1584_s12 = smov %s1393_s13 }
 0x155   : > { %p10_p12 = scmp.ge.s32.totalorder %s13_s16, 4   ;;  %s1585_s13 = smov %s1463_s20 }
 0x156   : > { %s1586_s14 = smov %s1401_s15  ;;  %s1587_s15 = smov %s1589_s17 }
 0x157   :  { %12 = sbr.rel (!%p10_p12) target bundleno = 3 (0x3), region = 101 }

</bundles_post_ra>
